<compile_context>
chip_gen: v7x
topology: tpu7x:2x2x1
jax: 0.10.0
libtpu: 0.0.40
codegen_flags: <defaults>
</compile_context>

<pallas_src>
import math

import jax
import jax.numpy as jnp
from jax import lax
from jax.experimental import pallas as pl
from jax.experimental.pallas import tpu as pltpu

# ----- model dimensions (small, consistent with the module's forward) -----
B, S, H = 2, 8, 128            # batch, sequence, working hidden size
BS = B * S                     # flattened row count presented to the MXU
NUM_HEADS = 4
HEAD_DIM = H // NUM_HEADS
LANG_DIM = 64                  # language embedding size (nn.Embedding(7, 64))
CLS_HID = 512                  # classifier projection width
NUM_LABELS = 6
LN_EPS = 1e-5                  # PyTorch LayerNorm default eps
ATTN_SCALE = 1.0 / math.sqrt(HEAD_DIM)
BF16 = jnp.bfloat16
F32 = jnp.float32


def _layernorm(x, g, b):
    mu = jnp.mean(x, axis=-1, keepdims=True)
    var = jnp.mean((x - mu) ** 2, axis=-1, keepdims=True)
    return (x - mu) * jax.lax.rsqrt(var + LN_EPS) * g + b


def _gelu(x):
    # exact (erf-based) GELU, matching nn.GELU() default
    return 0.5 * x * (1.0 + jax.lax.erf(x * 0.7071067811865476))


def _fused_kernel(pre_in_ref, lang_c1_ref, bias_ref,
                  w_pre, b_pre, g_pre, be_pre,
                  w_qkvg, b_qkvg,
                  w_o, b_o,
                  w_post, b_post, g_post, be_post,
                  w_ga, g_gate, be_gate,
                  w_c1h, g_c, be_c,
                  w_cout, b_cout,
                  logits_ref, attn_ref, gmean_ref):
    pre_in = pre_in_ref[...]        # (BS, H+64)  bf16, [hidden | lang] per row
    bias = bias_ref[...]            # (BS, BS)    f32 additive attention mask

    # --- pre_attention_projection: single K=192 matmul + LN + GELU ---
    z = jnp.dot(pre_in, w_pre[...], preferred_element_type=F32) + b_pre[...]
    proj = _gelu(_layernorm(z, g_pre[...], be_pre[...]))                # (BS, H) f32
    proj_bf = proj.astype(BF16)

    # --- fused Q(pre-scaled) | K | V | gate-from-proj projection, N=512 ---
    qkvg = jnp.dot(proj_bf, w_qkvg[...], preferred_element_type=F32) + b_qkvg[...]
    q_bf = qkvg[:, 0 * H:1 * H].astype(BF16)                            # 128-lane aligned slices
    k_bf = qkvg[:, 1 * H:2 * H].astype(BF16)
    v_bf = qkvg[:, 2 * H:3 * H].astype(BF16)
    gp = qkvg[:, 3 * H:4 * H]                                           # f32, already has b_gate

    # --- MultiheadAttention (batch_first, eval -> no dropout) ---
    # TODO(synk): the 32-lane head slices below may lower to XLU lane moves; audit
    #             the bundle dump before restructuring (expected win is modest).
    w_o_full = w_o[...]                                                 # (H, H) bf16
    attn = jnp.zeros((BS, H), dtype=F32)
    for hh in range(NUM_HEADS):                                         # 4 heads, unrolled
        sl = slice(hh * HEAD_DIM, (hh + 1) * HEAD_DIM)
        qh, kh, vh = q_bf[:, sl], k_bf[:, sl], v_bf[:, sl]              # (BS, dh)
        s = lax.dot_general(qh, kh, (((1,), (1,)), ((), ())),           # q @ k^T, no transpose
                            preferred_element_type=F32) + bias
        s = s - jnp.max(s, axis=-1, keepdims=True)
        e = jnp.exp(s)
        p = e * pl.reciprocal(jnp.sum(e, axis=-1, keepdims=True), approx=True)
        ctx_h = jnp.dot(p.astype(BF16), vh, preferred_element_type=F32)
        # Fold the per-head output projection directly: no ctx scratch, no lane concat.
        attn = attn + jnp.dot(ctx_h.astype(BF16), w_o_full[sl, :],
                              preferred_element_type=F32)
    attn = attn + b_o[...]
    attn_ref[...] = attn                                                # (BS, H)

    # --- post_attention: Linear + LN + GELU ---
    post = _gelu(_layernorm(
        jnp.dot(attn.astype(BF16), w_post[...], preferred_element_type=F32) + b_post[...],
        g_post[...], be_post[...]))
    post_bf = post.astype(BF16)

    # --- gate: proj-part came from the fused matmul; only the post-part remains ---
    gz = gp + jnp.dot(post_bf, w_ga[...], preferred_element_type=F32)
    gate = jax.nn.sigmoid(_layernorm(gz, g_gate[...], be_gate[...]))    # (BS, H)

    # gate.mean(dim=1): exact f32 mean over each batch's S rows (sublane-aligned slices).
    gmean_ref[...] = jnp.concatenate(
        [jnp.mean(gate[b * S:(b + 1) * S, :], axis=0, keepdims=True) for b in range(B)],
        axis=0)                                                         # (B, H)

    features = proj * gate + post * (1.0 - gate)
    # CLS rows (token 0 of every batch), gathered into one (B, H) tile.
    pooled = jnp.concatenate([features[b * S:b * S + 1, :] for b in range(B)], axis=0)

    # --- LanguageAwareClassifier (eval: dropout identity) ---
    # lang contribution + b_c1 precomputed in the wrapper -> one matmul here.
    c = jnp.dot(pooled.astype(BF16), w_c1h[...], preferred_element_type=F32) + lang_c1_ref[...]
    c = _layernorm(jnp.tanh(c), g_c[...], be_c[...])
    logits_ref[...] = (jnp.dot(c.astype(BF16), w_cout[...], preferred_element_type=F32)
                       + b_cout[...])                                   # (B, NUM_LABELS)


def init_params(key):
    ks = jax.random.split(key, 13)

    def xav(k, shape):
        lim = math.sqrt(6.0 / (shape[0] + shape[1]))
        return jax.random.uniform(k, shape, jnp.float32, -lim, lim)

    p = {}
    p['lang_embed'] = xav(ks[0], (7, LANG_DIM))
    p['w_pre_h'] = xav(ks[1], (H, H)); p['w_pre_l'] = xav(ks[2], (LANG_DIM, H))
    p['b_pre'] = jnp.zeros((1, H)); p['g_pre'] = jnp.ones((1, H)); p['be_pre'] = jnp.zeros((1, H))
    p['w_q'] = xav(ks[3], (H, H)); p['w_k'] = xav(ks[4], (H, H)); p['w_v'] = xav(ks[5], (H, H))
    p['b_q'] = jnp.zeros((1, H)); p['b_k'] = jnp.zeros((1, H)); p['b_v'] = jnp.zeros((1, H))
    p['w_o'] = xav(ks[6], (H, H)); p['b_o'] = jnp.zeros((1, H))
    p['w_post'] = xav(ks[7], (H, H)); p['b_post'] = jnp.zeros((1, H))
    p['g_post'] = jnp.ones((1, H)); p['be_post'] = jnp.zeros((1, H))
    p['w_gp'] = xav(ks[8], (H, H)); p['w_ga'] = xav(ks[9], (H, H))
    p['b_gate'] = jnp.zeros((1, H)); p['g_gate'] = jnp.ones((1, H)); p['be_gate'] = jnp.zeros((1, H))
    p['w_c1h'] = xav(ks[10], (H, CLS_HID)); p['w_c1l'] = xav(ks[11], (LANG_DIM, CLS_HID))
    p['b_c1'] = jnp.zeros((1, CLS_HID)); p['g_c'] = jnp.ones((1, CLS_HID)); p['be_c'] = jnp.zeros((1, CLS_HID))
    p['w_cout'] = xav(ks[12], (CLS_HID, NUM_LABELS)); p['b_cout'] = jnp.zeros((1, NUM_LABELS))
    return p


def prepare_params(params):
    """One-time weight fusion + bf16 cast, hoisted off the per-call path."""
    bf = lambda x: x.astype(BF16)
    # pre_attention_projection: K-concat [W_h; W_lang] -> (H+64, H)
    w_pre = jnp.concatenate([params['w_pre_h'], params['w_pre_l']], axis=0)
    # fused Q|K|V|gate-from-proj: N-concat -> (H, 4H); ATTN_SCALE folded into Q
    w_qkvg = jnp.concatenate([params['w_q'] * ATTN_SCALE, params['w_k'],
                              params['w_v'], params['w_gp']], axis=1)
    b_qkvg = jnp.concatenate([params['b_q'] * ATTN_SCALE, params['b_k'],
                              params['b_v'], params['b_gate']], axis=1)
    prep = {
        'lang_embed': params['lang_embed'],              # gathered in the wrapper
        'w_c1l': bf(params['w_c1l']),                    # used in the wrapper (lang @ W)
        'b_c1': params['b_c1'],
        'kernel_args': [
            bf(w_pre), params['b_pre'], params['g_pre'], params['be_pre'],
            bf(w_qkvg), b_qkvg,
            bf(params['w_o']), params['b_o'],
            bf(params['w_post']), params['b_post'], params['g_post'], params['be_post'],
            bf(params['w_ga']), params['g_gate'], params['be_gate'],
            bf(params['w_c1h']), params['g_c'], params['be_c'],
            bf(params['w_cout']), params['b_cout'],
        ],
    }
    return prep


@jax.jit
def forward_pallas(hidden_states, lang_ids, attention_mask, prep):
    # Glue (all tiny, fused under this jit): embedding gather, K-concat of hidden
    # with per-row language embedding, additive attention-mask bias, and the
    # classifier's language contribution.
    # TODO(synk): torch clamps lang_ids to [0, 9] although the table has 7 rows
    #             (would be OOB); we clamp to the valid range [0, 6].
    lang_e = prep['lang_embed'][jnp.clip(lang_ids, 0, 6)]               # (B, LANG_DIM) f32
    lang_bf = lang_e.astype(BF16)
    lang_rows = jnp.broadcast_to(lang_bf[:, None, :], (B, S, LANG_DIM))
    pre_in = jnp.concatenate([hidden_states.astype(BF16), lang_rows],
                             axis=-1).reshape(BS, H + LANG_DIM)          # (BS, H+64) bf16

    # classifier language term (tiny (B,64)@(64,512) dot) + b_c1, precomputed
    lang_c1 = (jnp.dot(lang_bf, prep['w_c1l'], preferred_element_type=F32)
               + prep['b_c1'])                                           # (B, CLS_HID) f32

    # additive attention bias: same-batch block-diagonal AND key-valid -> 0, else -1e30
    key_ok = attention_mask.reshape(BS).astype(jnp.bool_)
    row_b = jnp.arange(BS, dtype=jnp.int32) // S
    same = row_b[:, None] == row_b[None, :]
    bias = jnp.where(jnp.logical_and(same, key_ok[None, :]),
                     jnp.float32(0.0), jnp.float32(-1e30))               # (BS, BS) f32

    inputs = [pre_in, lang_c1, bias] + list(prep['kernel_args'])
    vspec = pl.BlockSpec(memory_space=pltpu.MemorySpace.VMEM)
    out_shape = (
        jax.ShapeDtypeStruct((B, NUM_LABELS), jnp.float32),              # logits
        jax.ShapeDtypeStruct((BS, H), jnp.float32),                      # attention output
        jax.ShapeDtypeStruct((B, H), jnp.float32),                       # gate.mean(dim=1)
    )
    # Gridless single-TensorCore call: everything (~1 MiB) resides in VMEM. At these
    # toy shapes the kernel is latency-bound; splitting B=2 across cores would only
    # duplicate weight DMA + add grid overhead.
    logits, attn, gmean = pl.pallas_call(
        _fused_kernel,
        out_shape=out_shape,
        in_specs=[vspec] * len(inputs),
        out_specs=tuple([vspec] * 3),
    )(*inputs)

    probs = jax.nn.sigmoid(logits)          # kept out of the kernel (lane-sparse output)
    return {'loss': None, 'logits': logits, 'probabilities': probs,
            'hidden_states': hidden_states,
            'attention_weights': attn.reshape(B, S, H),
            'gate_values': gmean}


def forward_ref(hidden_states, lang_ids, attention_mask, params):
    """Pure-JAX reference of the same forward (eval mode, bf16 matmul operands,
    f32 accumulation, ATTN_SCALE folded into W_q like the kernel)."""
    bf = lambda x: x.astype(BF16)
    lang_e = params['lang_embed'][jnp.clip(lang_ids, 0, 6)]
    lang_bf = lang_e.astype(BF16)
    mask_f = attention_mask.astype(F32)
    hs_bf = hidden_states.astype(BF16)

    z = (jnp.einsum('bsh,hd->bsd', hs_bf, bf(params['w_pre_h']), preferred_element_type=F32)
         + jnp.einsum('bl,ld->bd', lang_bf, bf(params['w_pre_l']),
                      preferred_element_type=F32)[:, None, :]
         + params['b_pre'])
    proj = _gelu(_layernorm(z, params['g_pre'], params['be_pre']))
    proj_bf = proj.astype(BF16)

    q = (jnp.einsum('bsh,hd->bsd', proj_bf, bf(params['w_q'] * ATTN_SCALE),
                    preferred_element_type=F32) + params['b_q'] * ATTN_SCALE)
    k = jnp.einsum('bsh,hd->bsd', proj_bf, bf(params['w_k']), preferred_element_type=F32) + params['b_k']
    v = jnp.einsum('bsh,hd->bsd', proj_bf, bf(params['w_v']), preferred_element_type=F32) + params['b_v']
    qh = q.astype(BF16).reshape(B, S, NUM_HEADS, HEAD_DIM)
    kh = k.astype(BF16).reshape(B, S, NUM_HEADS, HEAD_DIM)
    vh = v.astype(BF16).reshape(B, S, NUM_HEADS, HEAD_DIM)
    scores = jnp.einsum('bqnd,bknd->bnqk', qh, kh, preferred_element_type=F32)
    scores = jnp.where(mask_f[:, None, None, :] > 0.5, scores, -1e30)
    pa = jax.nn.softmax(scores, axis=-1)
    ctx = jnp.einsum('bnqk,bknd->bqnd', pa.astype(BF16), vh,
                     preferred_element_type=F32).reshape(B, S, H)
    attn = jnp.einsum('bsh,hd->bsd', ctx.astype(BF16), bf(params['w_o']),
                      preferred_element_type=F32) + params['b_o']

    post = _gelu(_layernorm(
        jnp.einsum('bsh,hd->bsd', attn.astype(BF16), bf(params['w_post']),
                   preferred_element_type=F32) + params['b_post'],
        params['g_post'], params['be_post']))
    gz = (jnp.einsum('bsh,hd->bsd', proj_bf, bf(params['w_gp']), preferred_element_type=F32)
          + jnp.einsum('bsh,hd->bsd', post.astype(BF16), bf(params['w_ga']),
                       preferred_element_type=F32)
          + params['b_gate'])
    gate = jax.nn.sigmoid(_layernorm(gz, params['g_gate'], params['be_gate']))
    features = proj * gate + post * (1.0 - gate)
    pooled = features[:, 0]
    c = jnp.tanh(jnp.dot(pooled.astype(BF16), bf(params['w_c1h']), preferred_element_type=F32)
                 + jnp.dot(lang_bf, bf(params['w_c1l']), preferred_element_type=F32)
                 + params['b_c1'])
    c = _layernorm(c, params['g_c'], params['be_c'])
    logits = jnp.dot(c.astype(BF16), bf(params['w_cout']), preferred_element_type=F32) + params['b_cout']
    return {'logits': logits, 'probabilities': jax.nn.sigmoid(logits),
            'attention_weights': attn, 'gate_values': gate.mean(axis=1)}


if __name__ == "__main__":
    key = jax.random.PRNGKey(0)
    k_par, k_hs = jax.random.split(key)
    params = init_params(k_par)
    prep = prepare_params(params)            # one-time weight fusion + bf16 cast

    # Synthetic "last_hidden_state" standing in for the XLM-R encoder output.
    hidden_states = jax.random.normal(k_hs, (B, S, H), jnp.float32)
    lang_ids = jnp.array([1, 3], dtype=jnp.int32)
    attention_mask = jnp.array(
        [[1, 1, 1, 1, 1, 1, 1, 1],
         [1, 1, 1, 1, 1, 1, 0, 0]], dtype=jnp.bool_)

    out = forward_pallas(hidden_states, lang_ids, attention_mask, prep)
    jax.block_until_ready(out['logits'])

    ref = forward_ref(hidden_states, lang_ids, attention_mask, params)
    # bf16 matmul operands on both sides; tolerance covers the approximate EUP
    # reciprocal in the kernel's softmax and differing accumulation orders.
    for name in ('logits', 'probabilities', 'attention_weights', 'gate_values'):
        assert jnp.allclose(out[name], ref[name], atol=1e-2, rtol=1e-2), name

    print("KERNEL_OK")
</pallas_src>

<mosaic_0001>
module attributes {stable_mosaic.version = 11 : i64} {
  func.func @_fused_kernel(%arg0: memref<16x192xbf16, #tpu.memory_space<vmem>>, %arg1: memref<2x512xf32, #tpu.memory_space<vmem>>, %arg2: memref<16x16xf32, #tpu.memory_space<vmem>>, %arg3: memref<192x128xbf16, #tpu.memory_space<vmem>>, %arg4: memref<1x128xf32, #tpu.memory_space<vmem>>, %arg5: memref<1x128xf32, #tpu.memory_space<vmem>>, %arg6: memref<1x128xf32, #tpu.memory_space<vmem>>, %arg7: memref<128x512xbf16, #tpu.memory_space<vmem>>, %arg8: memref<1x512xf32, #tpu.memory_space<vmem>>, %arg9: memref<128x128xbf16, #tpu.memory_space<vmem>>, %arg10: memref<1x128xf32, #tpu.memory_space<vmem>>, %arg11: memref<128x128xbf16, #tpu.memory_space<vmem>>, %arg12: memref<1x128xf32, #tpu.memory_space<vmem>>, %arg13: memref<1x128xf32, #tpu.memory_space<vmem>>, %arg14: memref<1x128xf32, #tpu.memory_space<vmem>>, %arg15: memref<128x128xbf16, #tpu.memory_space<vmem>>, %arg16: memref<1x128xf32, #tpu.memory_space<vmem>>, %arg17: memref<1x128xf32, #tpu.memory_space<vmem>>, %arg18: memref<128x512xbf16, #tpu.memory_space<vmem>>, %arg19: memref<1x512xf32, #tpu.memory_space<vmem>>, %arg20: memref<1x512xf32, #tpu.memory_space<vmem>>, %arg21: memref<512x6xbf16, #tpu.memory_space<vmem>>, %arg22: memref<1x6xf32, #tpu.memory_space<vmem>>, %arg23: memref<2x6xf32, #tpu.memory_space<vmem>>, %arg24: memref<16x128xf32, #tpu.memory_space<vmem>>, %arg25: memref<2x128xf32, #tpu.memory_space<vmem>>) attributes {dimension_semantics = [], scalar_prefetch = 0 : i64, scratch_operands = 0 : i64, tpu.core_type = #tpu.core_type<tc>} {
    %c0 = arith.constant 0 : index
    %c0_0 = arith.constant 0 : index
    %0 = vector.load %arg0[%c0, %c0_0] : memref<16x192xbf16, #tpu.memory_space<vmem>>, vector<16x192xbf16>
    %c0_1 = arith.constant 0 : index
    %c0_2 = arith.constant 0 : index
    %1 = vector.load %arg2[%c0_1, %c0_2] : memref<16x16xf32, #tpu.memory_space<vmem>>, vector<16x16xf32>
    %c0_3 = arith.constant 0 : index
    %c0_4 = arith.constant 0 : index
    %2 = vector.load %arg3[%c0_3, %c0_4] : memref<192x128xbf16, #tpu.memory_space<vmem>>, vector<192x128xbf16>
    %cst = arith.constant dense<0.000000e+00> : vector<16x128xf32>
    %3 = tpu.matmul %0, %2, %cst {dimension_numbers = #tpu.dot_dimension_numbers<[1], [0], [0], [1], [0, 0, 1, 1], [], []>} : vector<16x192xbf16>, vector<192x128xbf16>, vector<16x128xf32> -> vector<16x128xf32>
    %c0_5 = arith.constant 0 : index
    %c0_6 = arith.constant 0 : index
    %4 = vector.load %arg4[%c0_5, %c0_6] : memref<1x128xf32, #tpu.memory_space<vmem>>, vector<1x128xf32>
    %5 = vector.broadcast %4 : vector<1x128xf32> to vector<16x128xf32>
    %6 = arith.addf %3, %5 : vector<16x128xf32>
    %c0_7 = arith.constant 0 : index
    %c0_8 = arith.constant 0 : index
    %7 = vector.load %arg5[%c0_7, %c0_8] : memref<1x128xf32, #tpu.memory_space<vmem>>, vector<1x128xf32>
    %c0_9 = arith.constant 0 : index
    %c0_10 = arith.constant 0 : index
    %8 = vector.load %arg6[%c0_9, %c0_10] : memref<1x128xf32, #tpu.memory_space<vmem>>, vector<1x128xf32>
    %cst_11 = arith.constant dense<0.000000e+00> : vector<16xf32>
    %9 = vector.multi_reduction <add>, %6, %cst_11 [1] : vector<16x128xf32> to vector<16xf32>
    %10 = vector.shape_cast %9 : vector<16xf32> to vector<16x1xf32>
    %cst_12 = arith.constant 1.280000e+02 : f32
    %11 = vector.broadcast %cst_12 : f32 to vector<16x1xf32>
    %12 = arith.divf %10, %11 : vector<16x1xf32>
    %13 = vector.broadcast %12 : vector<16x1xf32> to vector<16x128xf32>
    %14 = arith.subf %6, %13 : vector<16x128xf32>
    %15 = arith.mulf %14, %14 : vector<16x128xf32>
    %cst_13 = arith.constant dense<0.000000e+00> : vector<16xf32>
    %16 = vector.multi_reduction <add>, %15, %cst_13 [1] : vector<16x128xf32> to vector<16xf32>
    %17 = vector.shape_cast %16 : vector<16xf32> to vector<16x1xf32>
    %cst_14 = arith.constant 1.280000e+02 : f32
    %18 = vector.broadcast %cst_14 : f32 to vector<16x1xf32>
    %19 = arith.divf %17, %18 : vector<16x1xf32>
    %20 = vector.broadcast %12 : vector<16x1xf32> to vector<16x128xf32>
    %21 = arith.subf %6, %20 : vector<16x128xf32>
    %cst_15 = arith.constant 9.99999974E-6 : f32
    %22 = vector.broadcast %cst_15 : f32 to vector<16x1xf32>
    %23 = arith.addf %19, %22 : vector<16x1xf32>
    %24 = math.rsqrt %23 : vector<16x1xf32>
    %25 = vector.broadcast %24 : vector<16x1xf32> to vector<16x128xf32>
    %26 = arith.mulf %21, %25 : vector<16x128xf32>
    %27 = vector.broadcast %7 : vector<1x128xf32> to vector<16x128xf32>
    %28 = arith.mulf %26, %27 : vector<16x128xf32>
    %29 = vector.broadcast %8 : vector<1x128xf32> to vector<16x128xf32>
    %30 = arith.addf %28, %29 : vector<16x128xf32>
    %cst_16 = arith.constant 5.000000e-01 : f32
    %31 = vector.broadcast %cst_16 : f32 to vector<16x128xf32>
    %32 = arith.mulf %31, %30 : vector<16x128xf32>
    %cst_17 = arith.constant 0.707106769 : f32
    %33 = vector.broadcast %cst_17 : f32 to vector<16x128xf32>
    %34 = arith.mulf %30, %33 : vector<16x128xf32>
    %35 = math.erf %34 : vector<16x128xf32>
    %cst_18 = arith.constant 1.000000e+00 : f32
    %36 = vector.broadcast %cst_18 : f32 to vector<16x128xf32>
    %37 = arith.addf %36, %35 : vector<16x128xf32>
    %38 = arith.mulf %32, %37 : vector<16x128xf32>
    %39 = arith.truncf %38 : vector<16x128xf32> to vector<16x128xbf16>
    %c0_19 = arith.constant 0 : index
    %c0_20 = arith.constant 0 : index
    %40 = vector.load %arg7[%c0_19, %c0_20] : memref<128x512xbf16, #tpu.memory_space<vmem>>, vector<128x512xbf16>
    %cst_21 = arith.constant dense<0.000000e+00> : vector<16x512xf32>
    %41 = tpu.matmul %39, %40, %cst_21 {dimension_numbers = #tpu.dot_dimension_numbers<[1], [0], [0], [1], [0, 0, 1, 1], [], []>} : vector<16x128xbf16>, vector<128x512xbf16>, vector<16x512xf32> -> vector<16x512xf32>
    %c0_22 = arith.constant 0 : index
    %c0_23 = arith.constant 0 : index
    %42 = vector.load %arg8[%c0_22, %c0_23] : memref<1x512xf32, #tpu.memory_space<vmem>>, vector<1x512xf32>
    %43 = vector.broadcast %42 : vector<1x512xf32> to vector<16x512xf32>
    %44 = arith.addf %41, %43 : vector<16x512xf32>
    %45 = vector.extract_strided_slice %44 {offsets = [0, 0], sizes = [16, 128], strides = [1, 1]} : vector<16x512xf32> to vector<16x128xf32>
    %46 = arith.truncf %45 : vector<16x128xf32> to vector<16x128xbf16>
    %47 = vector.extract_strided_slice %44 {offsets = [0, 128], sizes = [16, 128], strides = [1, 1]} : vector<16x512xf32> to vector<16x128xf32>
    %48 = arith.truncf %47 : vector<16x128xf32> to vector<16x128xbf16>
    %49 = vector.extract_strided_slice %44 {offsets = [0, 256], sizes = [16, 128], strides = [1, 1]} : vector<16x512xf32> to vector<16x128xf32>
    %50 = arith.truncf %49 : vector<16x128xf32> to vector<16x128xbf16>
    %51 = vector.extract_strided_slice %44 {offsets = [0, 384], sizes = [16, 128], strides = [1, 1]} : vector<16x512xf32> to vector<16x128xf32>
    %c0_24 = arith.constant 0 : index
    %c0_25 = arith.constant 0 : index
    %52 = vector.load %arg9[%c0_24, %c0_25] : memref<128x128xbf16, #tpu.memory_space<vmem>>, vector<128x128xbf16>
    %cst_26 = arith.constant 0.000000e+00 : f32
    %53 = vector.broadcast %cst_26 : f32 to vector<16x128xf32>
    %54 = vector.extract_strided_slice %46 {offsets = [0, 0], sizes = [16, 32], strides = [1, 1]} : vector<16x128xbf16> to vector<16x32xbf16>
    %55 = vector.extract_strided_slice %48 {offsets = [0, 0], sizes = [16, 32], strides = [1, 1]} : vector<16x128xbf16> to vector<16x32xbf16>
    %56 = vector.extract_strided_slice %50 {offsets = [0, 0], sizes = [16, 32], strides = [1, 1]} : vector<16x128xbf16> to vector<16x32xbf16>
    %cst_27 = arith.constant dense<0.000000e+00> : vector<16x16xf32>
    %57 = tpu.matmul %54, %55, %cst_27 {dimension_numbers = #tpu.dot_dimension_numbers<[1], [1], [0], [0], [0, 0, 1, 0], [], []>} : vector<16x32xbf16>, vector<16x32xbf16>, vector<16x16xf32> -> vector<16x16xf32>
    %58 = arith.addf %57, %1 : vector<16x16xf32>
    %cst_28 = arith.constant dense<0xFF800000> : vector<16xf32>
    %59 = vector.multi_reduction <maximumf>, %58, %cst_28 [1] : vector<16x16xf32> to vector<16xf32>
    %60 = vector.shape_cast %59 : vector<16xf32> to vector<16x1xf32>
    %61 = vector.broadcast %60 : vector<16x1xf32> to vector<16x16xf32>
    %62 = arith.subf %58, %61 : vector<16x16xf32>
    %63 = math.exp %62 : vector<16x16xf32>
    %cst_29 = arith.constant dense<0.000000e+00> : vector<16xf32>
    %64 = vector.multi_reduction <add>, %63, %cst_29 [1] : vector<16x16xf32> to vector<16xf32>
    %65 = vector.shape_cast %64 : vector<16xf32> to vector<16x1xf32>
    %66 = tpu.reciprocal %65 {approx = true} : vector<16x1xf32> -> vector<16x1xf32>
    %67 = vector.broadcast %66 : vector<16x1xf32> to vector<16x16xf32>
    %68 = arith.mulf %63, %67 : vector<16x16xf32>
    %69 = arith.truncf %68 : vector<16x16xf32> to vector<16x16xbf16>
    %cst_30 = arith.constant dense<0.000000e+00> : vector<16x32xf32>
    %70 = tpu.matmul %69, %56, %cst_30 {dimension_numbers = #tpu.dot_dimension_numbers<[1], [0], [0], [1], [0, 0, 1, 1], [], []>} : vector<16x16xbf16>, vector<16x32xbf16>, vector<16x32xf32> -> vector<16x32xf32>
    %71 = arith.truncf %70 : vector<16x32xf32> to vector<16x32xbf16>
    %72 = vector.extract_strided_slice %52 {offsets = [0, 0], sizes = [32, 128], strides = [1, 1]} : vector<128x128xbf16> to vector<32x128xbf16>
    %cst_31 = arith.constant dense<0.000000e+00> : vector<16x128xf32>
    %73 = tpu.matmul %71, %72, %cst_31 {dimension_numbers = #tpu.dot_dimension_numbers<[1], [0], [0], [1], [0, 0, 1, 1], [], []>} : vector<16x32xbf16>, vector<32x128xbf16>, vector<16x128xf32> -> vector<16x128xf32>
    %74 = arith.addf %53, %73 : vector<16x128xf32>
    %75 = vector.extract_strided_slice %46 {offsets = [0, 32], sizes = [16, 32], strides = [1, 1]} : vector<16x128xbf16> to vector<16x32xbf16>
    %76 = vector.extract_strided_slice %48 {offsets = [0, 32], sizes = [16, 32], strides = [1, 1]} : vector<16x128xbf16> to vector<16x32xbf16>
    %77 = vector.extract_strided_slice %50 {offsets = [0, 32], sizes = [16, 32], strides = [1, 1]} : vector<16x128xbf16> to vector<16x32xbf16>
    %cst_32 = arith.constant dense<0.000000e+00> : vector<16x16xf32>
    %78 = tpu.matmul %75, %76, %cst_32 {dimension_numbers = #tpu.dot_dimension_numbers<[1], [1], [0], [0], [0, 0, 1, 0], [], []>} : vector<16x32xbf16>, vector<16x32xbf16>, vector<16x16xf32> -> vector<16x16xf32>
    %79 = arith.addf %78, %1 : vector<16x16xf32>
    %cst_33 = arith.constant dense<0xFF800000> : vector<16xf32>
    %80 = vector.multi_reduction <maximumf>, %79, %cst_33 [1] : vector<16x16xf32> to vector<16xf32>
    %81 = vector.shape_cast %80 : vector<16xf32> to vector<16x1xf32>
    %82 = vector.broadcast %81 : vector<16x1xf32> to vector<16x16xf32>
    %83 = arith.subf %79, %82 : vector<16x16xf32>
    %84 = math.exp %83 : vector<16x16xf32>
    %cst_34 = arith.constant dense<0.000000e+00> : vector<16xf32>
    %85 = vector.multi_reduction <add>, %84, %cst_34 [1] : vector<16x16xf32> to vector<16xf32>
    %86 = vector.shape_cast %85 : vector<16xf32> to vector<16x1xf32>
    %87 = tpu.reciprocal %86 {approx = true} : vector<16x1xf32> -> vector<16x1xf32>
    %88 = vector.broadcast %87 : vector<16x1xf32> to vector<16x16xf32>
    %89 = arith.mulf %84, %88 : vector<16x16xf32>
    %90 = arith.truncf %89 : vector<16x16xf32> to vector<16x16xbf16>
    %cst_35 = arith.constant dense<0.000000e+00> : vector<16x32xf32>
    %91 = tpu.matmul %90, %77, %cst_35 {dimension_numbers = #tpu.dot_dimension_numbers<[1], [0], [0], [1], [0, 0, 1, 1], [], []>} : vector<16x16xbf16>, vector<16x32xbf16>, vector<16x32xf32> -> vector<16x32xf32>
    %92 = arith.truncf %91 : vector<16x32xf32> to vector<16x32xbf16>
    %93 = vector.extract_strided_slice %52 {offsets = [32, 0], sizes = [32, 128], strides = [1, 1]} : vector<128x128xbf16> to vector<32x128xbf16>
    %cst_36 = arith.constant dense<0.000000e+00> : vector<16x128xf32>
    %94 = tpu.matmul %92, %93, %cst_36 {dimension_numbers = #tpu.dot_dimension_numbers<[1], [0], [0], [1], [0, 0, 1, 1], [], []>} : vector<16x32xbf16>, vector<32x128xbf16>, vector<16x128xf32> -> vector<16x128xf32>
    %95 = arith.addf %74, %94 : vector<16x128xf32>
    %96 = vector.extract_strided_slice %46 {offsets = [0, 64], sizes = [16, 32], strides = [1, 1]} : vector<16x128xbf16> to vector<16x32xbf16>
    %97 = vector.extract_strided_slice %48 {offsets = [0, 64], sizes = [16, 32], strides = [1, 1]} : vector<16x128xbf16> to vector<16x32xbf16>
    %98 = vector.extract_strided_slice %50 {offsets = [0, 64], sizes = [16, 32], strides = [1, 1]} : vector<16x128xbf16> to vector<16x32xbf16>
    %cst_37 = arith.constant dense<0.000000e+00> : vector<16x16xf32>
    %99 = tpu.matmul %96, %97, %cst_37 {dimension_numbers = #tpu.dot_dimension_numbers<[1], [1], [0], [0], [0, 0, 1, 0], [], []>} : vector<16x32xbf16>, vector<16x32xbf16>, vector<16x16xf32> -> vector<16x16xf32>
    %100 = arith.addf %99, %1 : vector<16x16xf32>
    %cst_38 = arith.constant dense<0xFF800000> : vector<16xf32>
    %101 = vector.multi_reduction <maximumf>, %100, %cst_38 [1] : vector<16x16xf32> to vector<16xf32>
    %102 = vector.shape_cast %101 : vector<16xf32> to vector<16x1xf32>
    %103 = vector.broadcast %102 : vector<16x1xf32> to vector<16x16xf32>
    %104 = arith.subf %100, %103 : vector<16x16xf32>
    %105 = math.exp %104 : vector<16x16xf32>
    %cst_39 = arith.constant dense<0.000000e+00> : vector<16xf32>
    %106 = vector.multi_reduction <add>, %105, %cst_39 [1] : vector<16x16xf32> to vector<16xf32>
    %107 = vector.shape_cast %106 : vector<16xf32> to vector<16x1xf32>
    %108 = tpu.reciprocal %107 {approx = true} : vector<16x1xf32> -> vector<16x1xf32>
    %109 = vector.broadcast %108 : vector<16x1xf32> to vector<16x16xf32>
    %110 = arith.mulf %105, %109 : vector<16x16xf32>
    %111 = arith.truncf %110 : vector<16x16xf32> to vector<16x16xbf16>
    %cst_40 = arith.constant dense<0.000000e+00> : vector<16x32xf32>
    %112 = tpu.matmul %111, %98, %cst_40 {dimension_numbers = #tpu.dot_dimension_numbers<[1], [0], [0], [1], [0, 0, 1, 1], [], []>} : vector<16x16xbf16>, vector<16x32xbf16>, vector<16x32xf32> -> vector<16x32xf32>
    %113 = arith.truncf %112 : vector<16x32xf32> to vector<16x32xbf16>
    %114 = vector.extract_strided_slice %52 {offsets = [64, 0], sizes = [32, 128], strides = [1, 1]} : vector<128x128xbf16> to vector<32x128xbf16>
    %cst_41 = arith.constant dense<0.000000e+00> : vector<16x128xf32>
    %115 = tpu.matmul %113, %114, %cst_41 {dimension_numbers = #tpu.dot_dimension_numbers<[1], [0], [0], [1], [0, 0, 1, 1], [], []>} : vector<16x32xbf16>, vector<32x128xbf16>, vector<16x128xf32> -> vector<16x128xf32>
    %116 = arith.addf %95, %115 : vector<16x128xf32>
    %117 = vector.extract_strided_slice %46 {offsets = [0, 96], sizes = [16, 32], strides = [1, 1]} : vector<16x128xbf16> to vector<16x32xbf16>
    %118 = vector.extract_strided_slice %48 {offsets = [0, 96], sizes = [16, 32], strides = [1, 1]} : vector<16x128xbf16> to vector<16x32xbf16>
    %119 = vector.extract_strided_slice %50 {offsets = [0, 96], sizes = [16, 32], strides = [1, 1]} : vector<16x128xbf16> to vector<16x32xbf16>
    %cst_42 = arith.constant dense<0.000000e+00> : vector<16x16xf32>
    %120 = tpu.matmul %117, %118, %cst_42 {dimension_numbers = #tpu.dot_dimension_numbers<[1], [1], [0], [0], [0, 0, 1, 0], [], []>} : vector<16x32xbf16>, vector<16x32xbf16>, vector<16x16xf32> -> vector<16x16xf32>
    %121 = arith.addf %120, %1 : vector<16x16xf32>
    %cst_43 = arith.constant dense<0xFF800000> : vector<16xf32>
    %122 = vector.multi_reduction <maximumf>, %121, %cst_43 [1] : vector<16x16xf32> to vector<16xf32>
    %123 = vector.shape_cast %122 : vector<16xf32> to vector<16x1xf32>
    %124 = vector.broadcast %123 : vector<16x1xf32> to vector<16x16xf32>
    %125 = arith.subf %121, %124 : vector<16x16xf32>
    %126 = math.exp %125 : vector<16x16xf32>
    %cst_44 = arith.constant dense<0.000000e+00> : vector<16xf32>
    %127 = vector.multi_reduction <add>, %126, %cst_44 [1] : vector<16x16xf32> to vector<16xf32>
    %128 = vector.shape_cast %127 : vector<16xf32> to vector<16x1xf32>
    %129 = tpu.reciprocal %128 {approx = true} : vector<16x1xf32> -> vector<16x1xf32>
    %130 = vector.broadcast %129 : vector<16x1xf32> to vector<16x16xf32>
    %131 = arith.mulf %126, %130 : vector<16x16xf32>
    %132 = arith.truncf %131 : vector<16x16xf32> to vector<16x16xbf16>
    %cst_45 = arith.constant dense<0.000000e+00> : vector<16x32xf32>
    %133 = tpu.matmul %132, %119, %cst_45 {dimension_numbers = #tpu.dot_dimension_numbers<[1], [0], [0], [1], [0, 0, 1, 1], [], []>} : vector<16x16xbf16>, vector<16x32xbf16>, vector<16x32xf32> -> vector<16x32xf32>
    %134 = arith.truncf %133 : vector<16x32xf32> to vector<16x32xbf16>
    %135 = vector.extract_strided_slice %52 {offsets = [96, 0], sizes = [32, 128], strides = [1, 1]} : vector<128x128xbf16> to vector<32x128xbf16>
    %cst_46 = arith.constant dense<0.000000e+00> : vector<16x128xf32>
    %136 = tpu.matmul %134, %135, %cst_46 {dimension_numbers = #tpu.dot_dimension_numbers<[1], [0], [0], [1], [0, 0, 1, 1], [], []>} : vector<16x32xbf16>, vector<32x128xbf16>, vector<16x128xf32> -> vector<16x128xf32>
    %137 = arith.addf %116, %136 : vector<16x128xf32>
    %c0_47 = arith.constant 0 : index
    %c0_48 = arith.constant 0 : index
    %138 = vector.load %arg10[%c0_47, %c0_48] : memref<1x128xf32, #tpu.memory_space<vmem>>, vector<1x128xf32>
    %139 = vector.broadcast %138 : vector<1x128xf32> to vector<16x128xf32>
    %140 = arith.addf %137, %139 : vector<16x128xf32>
    %c0_49 = arith.constant 0 : index
    %c0_50 = arith.constant 0 : index
    %141 = vector.load %arg24[%c0_49, %c0_50] : memref<16x128xf32, #tpu.memory_space<vmem>>, vector<16x128xf32>
    tpu.vector_store %arg24[%c0_49, %c0_50], %140 {strides = array<i32>} : memref<16x128xf32, #tpu.memory_space<vmem>>, vector<16x128xf32>,
    %142 = arith.truncf %140 : vector<16x128xf32> to vector<16x128xbf16>
    %c0_51 = arith.constant 0 : index
    %c0_52 = arith.constant 0 : index
    %143 = vector.load %arg11[%c0_51, %c0_52] : memref<128x128xbf16, #tpu.memory_space<vmem>>, vector<128x128xbf16>
    %cst_53 = arith.constant dense<0.000000e+00> : vector<16x128xf32>
    %144 = tpu.matmul %142, %143, %cst_53 {dimension_numbers = #tpu.dot_dimension_numbers<[1], [0], [0], [1], [0, 0, 1, 1], [], []>} : vector<16x128xbf16>, vector<128x128xbf16>, vector<16x128xf32> -> vector<16x128xf32>
    %c0_54 = arith.constant 0 : index
    %c0_55 = arith.constant 0 : index
    %145 = vector.load %arg12[%c0_54, %c0_55] : memref<1x128xf32, #tpu.memory_space<vmem>>, vector<1x128xf32>
    %146 = vector.broadcast %145 : vector<1x128xf32> to vector<16x128xf32>
    %147 = arith.addf %144, %146 : vector<16x128xf32>
    %c0_56 = arith.constant 0 : index
    %c0_57 = arith.constant 0 : index
    %148 = vector.load %arg13[%c0_56, %c0_57] : memref<1x128xf32, #tpu.memory_space<vmem>>, vector<1x128xf32>
    %c0_58 = arith.constant 0 : index
    %c0_59 = arith.constant 0 : index
    %149 = vector.load %arg14[%c0_58, %c0_59] : memref<1x128xf32, #tpu.memory_space<vmem>>, vector<1x128xf32>
    %cst_60 = arith.constant dense<0.000000e+00> : vector<16xf32>
    %150 = vector.multi_reduction <add>, %147, %cst_60 [1] : vector<16x128xf32> to vector<16xf32>
    %151 = vector.shape_cast %150 : vector<16xf32> to vector<16x1xf32>
    %cst_61 = arith.constant 1.280000e+02 : f32
    %152 = vector.broadcast %cst_61 : f32 to vector<16x1xf32>
    %153 = arith.divf %151, %152 : vector<16x1xf32>
    %154 = vector.broadcast %153 : vector<16x1xf32> to vector<16x128xf32>
    %155 = arith.subf %147, %154 : vector<16x128xf32>
    %156 = arith.mulf %155, %155 : vector<16x128xf32>
    %cst_62 = arith.constant dense<0.000000e+00> : vector<16xf32>
    %157 = vector.multi_reduction <add>, %156, %cst_62 [1] : vector<16x128xf32> to vector<16xf32>
    %158 = vector.shape_cast %157 : vector<16xf32> to vector<16x1xf32>
    %cst_63 = arith.constant 1.280000e+02 : f32
    %159 = vector.broadcast %cst_63 : f32 to vector<16x1xf32>
    %160 = arith.divf %158, %159 : vector<16x1xf32>
    %161 = vector.broadcast %153 : vector<16x1xf32> to vector<16x128xf32>
    %162 = arith.subf %147, %161 : vector<16x128xf32>
    %cst_64 = arith.constant 9.99999974E-6 : f32
    %163 = vector.broadcast %cst_64 : f32 to vector<16x1xf32>
    %164 = arith.addf %160, %163 : vector<16x1xf32>
    %165 = math.rsqrt %164 : vector<16x1xf32>
    %166 = vector.broadcast %165 : vector<16x1xf32> to vector<16x128xf32>
    %167 = arith.mulf %162, %166 : vector<16x128xf32>
    %168 = vector.broadcast %148 : vector<1x128xf32> to vector<16x128xf32>
    %169 = arith.mulf %167, %168 : vector<16x128xf32>
    %170 = vector.broadcast %149 : vector<1x128xf32> to vector<16x128xf32>
    %171 = arith.addf %169, %170 : vector<16x128xf32>
    %cst_65 = arith.constant 5.000000e-01 : f32
    %172 = vector.broadcast %cst_65 : f32 to vector<16x128xf32>
    %173 = arith.mulf %172, %171 : vector<16x128xf32>
    %cst_66 = arith.constant 0.707106769 : f32
    %174 = vector.broadcast %cst_66 : f32 to vector<16x128xf32>
    %175 = arith.mulf %171, %174 : vector<16x128xf32>
    %176 = math.erf %175 : vector<16x128xf32>
    %cst_67 = arith.constant 1.000000e+00 : f32
    %177 = vector.broadcast %cst_67 : f32 to vector<16x128xf32>
    %178 = arith.addf %177, %176 : vector<16x128xf32>
    %179 = arith.mulf %173, %178 : vector<16x128xf32>
    %180 = arith.truncf %179 : vector<16x128xf32> to vector<16x128xbf16>
    %c0_68 = arith.constant 0 : index
    %c0_69 = arith.constant 0 : index
    %181 = vector.load %arg15[%c0_68, %c0_69] : memref<128x128xbf16, #tpu.memory_space<vmem>>, vector<128x128xbf16>
    %cst_70 = arith.constant dense<0.000000e+00> : vector<16x128xf32>
    %182 = tpu.matmul %180, %181, %cst_70 {dimension_numbers = #tpu.dot_dimension_numbers<[1], [0], [0], [1], [0, 0, 1, 1], [], []>} : vector<16x128xbf16>, vector<128x128xbf16>, vector<16x128xf32> -> vector<16x128xf32>
    %183 = arith.addf %51, %182 : vector<16x128xf32>
    %c0_71 = arith.constant 0 : index
    %c0_72 = arith.constant 0 : index
    %184 = vector.load %arg16[%c0_71, %c0_72] : memref<1x128xf32, #tpu.memory_space<vmem>>, vector<1x128xf32>
    %c0_73 = arith.constant 0 : index
    %c0_74 = arith.constant 0 : index
    %185 = vector.load %arg17[%c0_73, %c0_74] : memref<1x128xf32, #tpu.memory_space<vmem>>, vector<1x128xf32>
    %cst_75 = arith.constant dense<0.000000e+00> : vector<16xf32>
    %186 = vector.multi_reduction <add>, %183, %cst_75 [1] : vector<16x128xf32> to vector<16xf32>
    %187 = vector.shape_cast %186 : vector<16xf32> to vector<16x1xf32>
    %cst_76 = arith.constant 1.280000e+02 : f32
    %188 = vector.broadcast %cst_76 : f32 to vector<16x1xf32>
    %189 = arith.divf %187, %188 : vector<16x1xf32>
    %190 = vector.broadcast %189 : vector<16x1xf32> to vector<16x128xf32>
    %191 = arith.subf %183, %190 : vector<16x128xf32>
    %192 = arith.mulf %191, %191 : vector<16x128xf32>
    %cst_77 = arith.constant dense<0.000000e+00> : vector<16xf32>
    %193 = vector.multi_reduction <add>, %192, %cst_77 [1] : vector<16x128xf32> to vector<16xf32>
    %194 = vector.shape_cast %193 : vector<16xf32> to vector<16x1xf32>
    %cst_78 = arith.constant 1.280000e+02 : f32
    %195 = vector.broadcast %cst_78 : f32 to vector<16x1xf32>
    %196 = arith.divf %194, %195 : vector<16x1xf32>
    %197 = vector.broadcast %189 : vector<16x1xf32> to vector<16x128xf32>
    %198 = arith.subf %183, %197 : vector<16x128xf32>
    %cst_79 = arith.constant 9.99999974E-6 : f32
    %199 = vector.broadcast %cst_79 : f32 to vector<16x1xf32>
    %200 = arith.addf %196, %199 : vector<16x1xf32>
    %201 = math.rsqrt %200 : vector<16x1xf32>
    %202 = vector.broadcast %201 : vector<16x1xf32> to vector<16x128xf32>
    %203 = arith.mulf %198, %202 : vector<16x128xf32>
    %204 = vector.broadcast %184 : vector<1x128xf32> to vector<16x128xf32>
    %205 = arith.mulf %203, %204 : vector<16x128xf32>
    %206 = vector.broadcast %185 : vector<1x128xf32> to vector<16x128xf32>
    %207 = arith.addf %205, %206 : vector<16x128xf32>
    %208 = arith.negf %207 : vector<16x128xf32>
    %209 = math.exp %208 : vector<16x128xf32>
    %cst_80 = arith.constant 1.000000e+00 : f32
    %210 = vector.broadcast %cst_80 : f32 to vector<16x128xf32>
    %211 = arith.addf %210, %209 : vector<16x128xf32>
    %212 = arith.divf %210, %211 : vector<16x128xf32>
    %213 = vector.extract_strided_slice %212 {offsets = [0, 0], sizes = [8, 128], strides = [1, 1]} : vector<16x128xf32> to vector<8x128xf32>
    %cst_81 = arith.constant dense<0.000000e+00> : vector<128xf32>
    %214 = vector.multi_reduction <add>, %213, %cst_81 [0] : vector<8x128xf32> to vector<128xf32>
    %215 = vector.shape_cast %214 : vector<128xf32> to vector<1x128xf32>
    %cst_82 = arith.constant 8.000000e+00 : f32
    %216 = vector.broadcast %cst_82 : f32 to vector<1x128xf32>
    %217 = arith.divf %215, %216 : vector<1x128xf32>
    %218 = vector.extract_strided_slice %212 {offsets = [8, 0], sizes = [8, 128], strides = [1, 1]} : vector<16x128xf32> to vector<8x128xf32>
    %cst_83 = arith.constant dense<0.000000e+00> : vector<128xf32>
    %219 = vector.multi_reduction <add>, %218, %cst_83 [0] : vector<8x128xf32> to vector<128xf32>
    %220 = vector.shape_cast %219 : vector<128xf32> to vector<1x128xf32>
    %cst_84 = arith.constant 8.000000e+00 : f32
    %221 = vector.broadcast %cst_84 : f32 to vector<1x128xf32>
    %222 = arith.divf %220, %221 : vector<1x128xf32>
    %223 = tpu.concatenate %217, %222 in 0 : vector<1x128xf32>, vector<1x128xf32> -> vector<2x128xf32>
    %c0_85 = arith.constant 0 : index
    %c0_86 = arith.constant 0 : index
    %224 = vector.load %arg25[%c0_85, %c0_86] : memref<2x128xf32, #tpu.memory_space<vmem>>, vector<2x128xf32>
    tpu.vector_store %arg25[%c0_85, %c0_86], %223 {strides = array<i32>} : memref<2x128xf32, #tpu.memory_space<vmem>>, vector<2x128xf32>,
    %225 = arith.mulf %38, %212 : vector<16x128xf32>
    %cst_87 = arith.constant 1.000000e+00 : f32
    %226 = vector.broadcast %cst_87 : f32 to vector<16x128xf32>
    %227 = arith.subf %226, %212 : vector<16x128xf32>
    %228 = arith.mulf %179, %227 : vector<16x128xf32>
    %229 = arith.addf %225, %228 : vector<16x128xf32>
    %230 = vector.extract_strided_slice %229 {offsets = [0, 0], sizes = [1, 128], strides = [1, 1]} : vector<16x128xf32> to vector<1x128xf32>
    %231 = vector.extract_strided_slice %229 {offsets = [8, 0], sizes = [1, 128], strides = [1, 1]} : vector<16x128xf32> to vector<1x128xf32>
    %232 = tpu.concatenate %230, %231 in 0 : vector<1x128xf32>, vector<1x128xf32> -> vector<2x128xf32>
    %233 = arith.truncf %232 : vector<2x128xf32> to vector<2x128xbf16>
    %c0_88 = arith.constant 0 : index
    %c0_89 = arith.constant 0 : index
    %234 = vector.load %arg18[%c0_88, %c0_89] : memref<128x512xbf16, #tpu.memory_space<vmem>>, vector<128x512xbf16>
    %cst_90 = arith.constant dense<0.000000e+00> : vector<2x512xf32>
    %235 = tpu.matmul %233, %234, %cst_90 {dimension_numbers = #tpu.dot_dimension_numbers<[1], [0], [0], [1], [0, 0, 1, 1], [], []>} : vector<2x128xbf16>, vector<128x512xbf16>, vector<2x512xf32> -> vector<2x512xf32>
    %c0_91 = arith.constant 0 : index
    %c0_92 = arith.constant 0 : index
    %236 = vector.load %arg1[%c0_91, %c0_92] : memref<2x512xf32, #tpu.memory_space<vmem>>, vector<2x512xf32>
    %237 = arith.addf %235, %236 : vector<2x512xf32>
    %238 = math.tanh %237 : vector<2x512xf32>
    %c0_93 = arith.constant 0 : index
    %c0_94 = arith.constant 0 : index
    %239 = vector.load %arg19[%c0_93, %c0_94] : memref<1x512xf32, #tpu.memory_space<vmem>>, vector<1x512xf32>
    %c0_95 = arith.constant 0 : index
    %c0_96 = arith.constant 0 : index
    %240 = vector.load %arg20[%c0_95, %c0_96] : memref<1x512xf32, #tpu.memory_space<vmem>>, vector<1x512xf32>
    %cst_97 = arith.constant dense<0.000000e+00> : vector<2xf32>
    %241 = vector.multi_reduction <add>, %238, %cst_97 [1] : vector<2x512xf32> to vector<2xf32>
    %242 = vector.shape_cast %241 : vector<2xf32> to vector<2x1xf32>
    %cst_98 = arith.constant 5.120000e+02 : f32
    %243 = vector.broadcast %cst_98 : f32 to vector<2x1xf32>
    %244 = arith.divf %242, %243 : vector<2x1xf32>
    %245 = vector.broadcast %244 : vector<2x1xf32> to vector<2x512xf32>
    %246 = arith.subf %238, %245 : vector<2x512xf32>
    %247 = arith.mulf %246, %246 : vector<2x512xf32>
    %cst_99 = arith.constant dense<0.000000e+00> : vector<2xf32>
    %248 = vector.multi_reduction <add>, %247, %cst_99 [1] : vector<2x512xf32> to vector<2xf32>
    %249 = vector.shape_cast %248 : vector<2xf32> to vector<2x1xf32>
    %cst_100 = arith.constant 5.120000e+02 : f32
    %250 = vector.broadcast %cst_100 : f32 to vector<2x1xf32>
    %251 = arith.divf %249, %250 : vector<2x1xf32>
    %252 = vector.broadcast %244 : vector<2x1xf32> to vector<2x512xf32>
    %253 = arith.subf %238, %252 : vector<2x512xf32>
    %cst_101 = arith.constant 9.99999974E-6 : f32
    %254 = vector.broadcast %cst_101 : f32 to vector<2x1xf32>
    %255 = arith.addf %251, %254 : vector<2x1xf32>
    %256 = math.rsqrt %255 : vector<2x1xf32>
    %257 = vector.broadcast %256 : vector<2x1xf32> to vector<2x512xf32>
    %258 = arith.mulf %253, %257 : vector<2x512xf32>
    %259 = vector.broadcast %239 : vector<1x512xf32> to vector<2x512xf32>
    %260 = arith.mulf %258, %259 : vector<2x512xf32>
    %261 = vector.broadcast %240 : vector<1x512xf32> to vector<2x512xf32>
    %262 = arith.addf %260, %261 : vector<2x512xf32>
    %263 = arith.truncf %262 : vector<2x512xf32> to vector<2x512xbf16>
    %c0_102 = arith.constant 0 : index
    %c0_103 = arith.constant 0 : index
    %264 = vector.load %arg21[%c0_102, %c0_103] : memref<512x6xbf16, #tpu.memory_space<vmem>>, vector<512x6xbf16>
    %cst_104 = arith.constant dense<0.000000e+00> : vector<2x6xf32>
    %265 = tpu.matmul %263, %264, %cst_104 {dimension_numbers = #tpu.dot_dimension_numbers<[1], [0], [0], [1], [0, 0, 1, 1], [], []>} : vector<2x512xbf16>, vector<512x6xbf16>, vector<2x6xf32> -> vector<2x6xf32>
    %c0_105 = arith.constant 0 : index
    %c0_106 = arith.constant 0 : index
    %266 = vector.load %arg22[%c0_105, %c0_106] : memref<1x6xf32, #tpu.memory_space<vmem>>, vector<1x6xf32>
    %267 = vector.broadcast %266 : vector<1x6xf32> to vector<2x6xf32>
    %268 = arith.addf %265, %267 : vector<2x6xf32>
    %c0_107 = arith.constant 0 : index
    %c0_108 = arith.constant 0 : index
    %269 = vector.load %arg23[%c0_107, %c0_108] : memref<2x6xf32, #tpu.memory_space<vmem>>, vector<2x6xf32>
    tpu.vector_store %arg23[%c0_107, %c0_108], %268 {strides = array<i32>} : memref<2x6xf32, #tpu.memory_space<vmem>>, vector<2x6xf32>,
    return
  }
}

</mosaic_0001>

<bundles_post_ra>
// kernel: forward_pallas.1
= control target key start
LH: loop header
LB: loop body
LE: loop exit
PB: predicated region body
PF: predicated region fallthrough
CT: control target
= control target key end

     0   :  { %s4585_s0 = inlined_call_operand.vmem [shape: bf16[16,192], index: 0, kind: input, shape index: {}]   ;;  %s4586_s1 = inlined_call_operand.vmem [shape: f32[2,512], index: 1, kind: input, shape index: {}]   ;;  %s4587_s2 = inlined_call_operand.vmem [shape: f32[16,16], index: 2, kind: input, shape index: {}]   ;;  %s4588_s3 = inlined_call_operand.hbm [shape: bf16[192,128], index: 3, kind: input, shape index: {}]   ;;  %s4589_s4 = inlined_call_operand.vmem [shape: f32[1,128], index: 4, kind: input, shape index: {}]   ;;  %s4590_s5 = inlined_call_operand.vmem [shape: f32[1,128], index: 5, kind: input, shape index: {}]   ;;  %s4591_s6 = inlined_call_operand.hbm [shape: f32[1,128], index: 6, kind: input, shape index: {}]   ;;  %s4592_s7 = inlined_call_operand.vmem [shape: bf16[128,512], index: 7, kind: input, shape index: {}]   ;;  %s4593_s8 = inlined_call_operand.hbm [shape: f32[1,512], index: 8, kind: input, shape index: {}]   ;;  %s4594_s9 = inlined_call_operand.hbm [shape: bf16[128,128], index: 9, kind: input, shape index: {}]   ;;  %s4595_s10 = inlined_call_operand.hbm [shape: f32[1,128], index: 10, kind: input, shape index: {}]   ;;  %s4596_s11 = inlined_call_operand.hbm [shape: bf16[128,128], index: 11, kind: input, shape index: {}]   ;;  %s4597_s12 = inlined_call_operand.hbm [shape: f32[1,128], index: 12, kind: input, shape index: {}]   ;;  %s4598_s13 = inlined_call_operand.hbm [shape: f32[1,128], index: 13, kind: input, shape index: {}]   ;;  %s4599_s14 = inlined_call_operand.hbm [shape: f32[1,128], index: 14, kind: input, shape index: {}]   ;;  %s4600_s15 = inlined_call_operand.vmem [shape: bf16[128,128], index: 15, kind: input, shape index: {}]   ;;  %s4601_s16 = inlined_call_operand.hbm [shape: f32[1,128], index: 16, kind: input, shape index: {}]   ;;  %s4602_s17 = inlined_call_operand.hbm [shape: f32[1,128], index: 17, kind: input, shape index: {}]   ;;  %s4603_s18 = inlined_call_operand.vmem [shape: bf16[128,512], index: 18, kind: input, shape index: {}]   ;;  %s4604_s19 = inlined_call_operand.hbm [shape: f32[1,512], index: 19, kind: input, shape index: {}]   ;;  %s4605_s20 = inlined_call_operand.hbm [shape: f32[1,512], index: 20, kind: input, shape index: {}]   ;;  %s4606_s21 = inlined_call_operand.vmem [shape: bf16[512,6], index: 21, kind: input, shape index: {}]   ;;  %s4607_s22 = inlined_call_operand.hbm [shape: f32[1,6], index: 22, kind: input, shape index: {}]   ;;  %s4608_s23 = inlined_call_operand.vmem [shape: f32[2,6], index: 23, kind: output, shape index: {0}]   ;;  %s4609_s24 = inlined_call_operand.hbm [shape: f32[16,128], index: 24, kind: output, shape index: {1}]   ;;  %s4610_s25 = inlined_call_operand.hbm [shape: f32[2,128], index: 25, kind: output, shape index: {2}]  }
   0x1   :  { %4618 = sst [smem:[#allocation38_spill]] %s4585_s0 }
   0x2   :  { %4619 = sst [smem:[#allocation39_spill]] %s4586_s1 }
   0x3   :  { %4620 = sst [smem:[#allocation40_spill]] %s4587_s2 }
   0x4   :  { %4621 = sst [smem:[#allocation41_spill]] %s4588_s3 }
   0x5   :  { %4622 = sst [smem:[#allocation42_spill]] %s4589_s4 }
   0x6   :  { %4623 = sst [smem:[#allocation43_spill]] %s4590_s5 }
   0x7   :  { %4624 = sst [smem:[#allocation44_spill]] %s4591_s6 }
   0x8   :  { %4625 = sst [smem:[#allocation45_spill]] %s4592_s7 }
   0x9   :  { %4626 = sst [smem:[#allocation46_spill]] %s4593_s8 }
   0xa   :  { %4627 = sst [smem:[#allocation47_spill]] %s4594_s9 }
   0xb   :  { %4628 = sst [smem:[#allocation48_spill]] %s4608_s23 }
   0xc   :  { %31 = vsyncpa [#allocation3], 0 }
   0xd   :  { %32 = vsyncpa [#allocation6], 0 }
   0xe   :  { %33 = vsyncpa [#allocation9], 0 }
   0xf   :  { %34 = vsyncpa [#allocation12], 0 }
  0x10   :  { %35 = vsyncpa [#allocation15], 0 }
  0x11   :  { %36 = vsyncpa [#allocation18], 0 }
  0x12   :  { %37 = vsyncpa [#allocation21], 0 }
  0x13   :  { %38 = vsyncpa [#allocation24], 0 }
  0x14   :  { %39 = vsyncpa [#allocation4], 0 }
  0x15   :  { %40 = vsyncpa [#allocation27], 0  ;;  %s3644_s29 = smov [#allocation5]   ;;  %s4629_s7 = sld [smem:[#allocation44_spill]] }
  0x16   :  { %s69_s2 = sshll.u32 %s3644_s29, 4  ;;  %s70_s2 = int_to_ptr.vmem [resolvable:$true] %s69_s2 }
  0x1b   :  { %s3272_s3 = scalar_lea.hbm %s4629_s7, 16 }
  0x1c   :  { %p3273_p0 = scmp.ne.s32.totalorder %s4629_s7, %s3272_s3  ;;  %p3276_p1 = scmp.lt.u32.totalorder %s3272_s3, %s4629_s7 }
  0x1e   :  { %p3278_p2 = pnand %p3276_p1, %p3273_p0 }
  0x20   :  { %3281 = shalt.err (!%p3278_p2)
}
  0x21   :  { %s3282_s4 = scalar_lea.vmem %s70_s2, 16  ;;  %s3286_s28 = scalar_lea.vmem %s70_s2, 32 }
  0x22   :  { %p3283_p3 = scmp.ne.s32.totalorder %s70_s2, %s3282_s4  ;;  %p3287_p4 = scmp.lt.s32.totalorder %s70_s2, %s70_s2 }
  0x23   :  { %p3288_p5 = scmp.lt.s32.totalorder %s3286_s28, %s3282_s4 }
  0x25   :  { %p3289_p6 = por %p3288_p5, %p3287_p4 }
  0x27   :  { %p3290_p7 = pnand %p3289_p6, %p3283_p3 }
  0x29   :  { %3293 = shalt.err (!%p3290_p7)
}
  0x2a   :  { %72 = dma.hbm_to_vmem [thread:$0]  %s4629_s7, 16, %s70_s2, [#allocation6]  }
  0x2b   :  { %s3645_s0 = smov [#allocation8]   ;;  %s3646_s6 = smov [#allocation11]  }
  0x2c   :  { %s90_s29 = sshll.u32 %s3645_s0, 4  ;;  %s112_s30 = sshll.u32 %s3646_s6, 4  ;;  %s91_s29 = int_to_ptr.vmem [resolvable:$true] %s90_s29  ;;  %s113_s30 = int_to_ptr.vmem [resolvable:$true] %s112_s30 }
  0x2d   :  { %s4630_s1 = sld [smem:[#allocation47_spill]] }
  0x33   :  { %s3294_s8 = scalar_lea.hbm %s4630_s1, 1024 }
  0x34   :  { %p3295_p8 = scmp.ne.s32.totalorder %s4630_s1, %s3294_s8  ;;  %p3298_p9 = scmp.lt.u32.totalorder %s3294_s8, %s4630_s1 }
  0x36   :  { %p3300_p10 = pnand %p3298_p9, %p3295_p8 }
  0x38   :  { %3303 = shalt.err (!%p3300_p10)
}
  0x39   :  { %s3304_s2 = scalar_lea.vmem %s91_s29, 1024  ;;  %p3309_p12 = scmp.lt.s32.totalorder %s91_s29, %s91_s29 }
  0x3a   :  { %p3305_p11 = scmp.ne.s32.totalorder %s91_s29, %s3304_s2  ;;  %p3310_p13 = scmp.lt.s32.totalorder %s3304_s2, %s3304_s2 }
  0x3c   :  { %p3311_p0 = por %p3310_p13, %p3309_p12 }
  0x3e   :  { %p3312_p1 = pnand %p3311_p0, %p3305_p11 }
  0x40   :  { %3315 = shalt.err (!%p3312_p1)
}
  0x41   :  { %s3647_s7 = smov 64   ;;  %s3648_s9 = smov 4  }
  0x42   :  { %96 = dma.hbm_to_vmem [thread:$0]  %s4630_s1, 1024, %s91_s29, [#allocation9], %s3647_s7, %s3647_s7, %s3648_s9  }
  0x43   :  { %s3316_s3 = scalar_lea.hbm %s4596_s11, 1024 }
  0x44   :  { %p3317_p2 = scmp.ne.s32.totalorder %s4596_s11, %s3316_s3  ;;  %p3320_p3 = scmp.lt.u32.totalorder %s3316_s3, %s4596_s11 }
  0x46   :  { %p3322_p4 = pnand %p3320_p3, %p3317_p2 }
  0x48   :  { %3325 = shalt.err (!%p3322_p4)
}
  0x49   :  { %s3326_s28 = scalar_lea.vmem %s113_s30, 1024  ;;  %p3331_p6 = scmp.lt.s32.totalorder %s113_s30, %s113_s30 }
  0x4a   :  { %p3327_p5 = scmp.ne.s32.totalorder %s113_s30, %s3326_s28  ;;  %p3332_p7 = scmp.lt.s32.totalorder %s3326_s28, %s3326_s28 }
  0x4c   :  { %p3333_p8 = por %p3332_p7, %p3331_p6 }
  0x4e   :  { %p3334_p9 = pnand %p3333_p8, %p3327_p5 }
  0x50   :  { %3337 = shalt.err (!%p3334_p9)
}
  0x51   :  { %118 = dma.hbm_to_vmem [thread:$0]  %s4596_s11, 1024, %s113_s30, [#allocation12], %s3647_s7, %s3647_s7, %s3648_s9  }
  0x52   :  { %s3649_s2 = smov [#allocation14]   ;;  %s3650_s5 = smov [#allocation17]  }
  0x53   :  { %s135_s23 = sshll.u32 %s3649_s2, 4  ;;  %s157_s0 = sshll.u32 %s3650_s5, 4  ;;  %s136_s23 = int_to_ptr.vmem [resolvable:$true] %s135_s23  ;;  %s158_s0 = int_to_ptr.vmem [resolvable:$true] %s157_s0 }
  0x54   :  { %s3338_s26 = scalar_lea.hbm %s4598_s13, 16 }
  0x55   :  { %p3339_p10 = scmp.ne.s32.totalorder %s4598_s13, %s3338_s26  ;;  %p3342_p11 = scmp.lt.u32.totalorder %s3338_s26, %s4598_s13 }
  0x57   :  { %p3344_p12 = pnand %p3342_p11, %p3339_p10 }
  0x59   :  { %3347 = shalt.err (!%p3344_p12)
}
  0x5a   :  { %s3348_s11 = scalar_lea.vmem %s136_s23, 16  ;;  %s3352_s30 = scalar_lea.vmem %s136_s23, 32 }
  0x5b   :  { %p3349_p13 = scmp.ne.s32.totalorder %s136_s23, %s3348_s11  ;;  %p3353_p0 = scmp.lt.s32.totalorder %s136_s23, %s136_s23 }
  0x5c   :  { %p3354_p1 = scmp.lt.s32.totalorder %s3352_s30, %s3348_s11 }
  0x5e   :  { %p3355_p2 = por %p3354_p1, %p3353_p0 }
  0x60   :  { %p3356_p3 = pnand %p3355_p2, %p3349_p13 }
  0x62   :  { %3359 = shalt.err (!%p3356_p3)
}
  0x63   :  { %138 = dma.hbm_to_vmem [thread:$0]  %s4598_s13, 16, %s136_s23, [#allocation15]  }
  0x64   :  { %s3360_s6 = scalar_lea.hbm %s4601_s16, 16 }
  0x65   :  { %p3361_p4 = scmp.ne.s32.totalorder %s4601_s16, %s3360_s6  ;;  %p3364_p5 = scmp.lt.u32.totalorder %s3360_s6, %s4601_s16 }
  0x67   :  { %p3366_p6 = pnand %p3364_p5, %p3361_p4 }
  0x69   :  { %3369 = shalt.err (!%p3366_p6)
}
  0x6a   :  { %s3370_s4 = scalar_lea.vmem %s158_s0, 16  ;;  %s3374_s28 = scalar_lea.vmem %s158_s0, 32 }
  0x6b   :  { %p3371_p7 = scmp.ne.s32.totalorder %s158_s0, %s3370_s4  ;;  %p3375_p8 = scmp.lt.s32.totalorder %s158_s0, %s158_s0 }
  0x6c   :  { %p3376_p9 = scmp.lt.s32.totalorder %s3374_s28, %s3370_s4 }
  0x6e   :  { %p3377_p10 = por %p3376_p9, %p3375_p8 }
  0x70   :  { %p3378_p11 = pnand %p3377_p10, %p3371_p7 }
  0x72   :  { %3381 = shalt.err (!%p3378_p11)
}
  0x73   :  { %160 = dma.hbm_to_vmem [thread:$0]  %s4601_s16, 16, %s158_s0, [#allocation18]  }
  0x74   :  { %s3651_s11 = smov [#allocation20]   ;;  %s3652_s29 = smov [#allocation2]  }
  0x75   :  { %s179_s30 = sshll.u32 %s3651_s11, 4  ;;  %s52_s1 = sshll.u32 %s3652_s29, 4  ;;  %s180_s30 = int_to_ptr.vmem [resolvable:$true] %s179_s30  ;;  %s53_s1 = int_to_ptr.vmem [resolvable:$true] %s52_s1 }
  0x76   :  { %s3382_s6 = scalar_lea.hbm %s4604_s19, 64 }
  0x77   :  { %p3383_p12 = scmp.ne.s32.totalorder %s4604_s19, %s3382_s6  ;;  %p3386_p13 = scmp.lt.u32.totalorder %s3382_s6, %s4604_s19 }
  0x79   :  { %p3388_p0 = pnand %p3386_p13, %p3383_p12 }
  0x7b   :  { %3391 = shalt.err (!%p3388_p0)
}
  0x7c   :  { %s3392_s16 = scalar_lea.vmem %s180_s30, 64  ;;  %p3397_p2 = scmp.lt.s32.totalorder %s180_s30, %s180_s30 }
  0x7d   :  { %p3393_p1 = scmp.ne.s32.totalorder %s180_s30, %s3392_s16  ;;  %p3398_p3 = scmp.lt.s32.totalorder %s3392_s16, %s3392_s16 }
  0x7f   :  { %p3399_p4 = por %p3398_p3, %p3397_p2 }
  0x81   :  { %p3400_p5 = pnand %p3399_p4, %p3393_p1 }
  0x83   :  { %3403 = shalt.err (!%p3400_p5)
}
  0x84   :  { %182 = dma.hbm_to_vmem [thread:$0]  %s4604_s19, 64, %s180_s30, [#allocation21]  }
  0x85   :  { %s4631_s23 = sld [smem:[#allocation41_spill]] }
  0x8b   :  { %s3404_s11 = scalar_lea.hbm %s4631_s23, 1536 }
  0x8c   :  { %p3405_p6 = scmp.ne.s32.totalorder %s4631_s23, %s3404_s11  ;;  %p3408_p7 = scmp.lt.u32.totalorder %s3404_s11, %s4631_s23 }
  0x8e   :  { %p3410_p8 = pnand %p3408_p7, %p3405_p6 }
  0x90   :  { %3413 = shalt.err (!%p3410_p8)
}
  0x91   :  { %s3414_s3 = scalar_lea.vmem %s53_s1, 1536  ;;  %p3419_p10 = scmp.lt.s32.totalorder %s53_s1, %s53_s1 }
  0x92   :  { %p3415_p9 = scmp.ne.s32.totalorder %s53_s1, %s3414_s3  ;;  %p3420_p11 = scmp.lt.s32.totalorder %s3414_s3, %s3414_s3 }
  0x94   :  { %p3421_p12 = por %p3420_p11, %p3419_p10 }
  0x96   :  { %p3422_p13 = pnand %p3421_p12, %p3415_p9 }
  0x98   :  { %3425 = shalt.err (!%p3422_p13)
}
  0x99   :  { %58 = dma.hbm_to_vmem [thread:$0]  %s4631_s23, 1536, %s53_s1, [#allocation3], %s3647_s7, %s3647_s7, %s3648_s9  }
  0x9a   :  { %s3653_s26 = smov [#allocation7]   ;;  %s3654_s27 = smov [#allocation10]  }
  0x9b   :  { %s81_s8 = sshll.u32 %s3653_s26, 4  ;;  %s103_s16 = sshll.u32 %s3654_s27, 4  ;;  %s82_s8 = int_to_ptr.vmem [resolvable:$true] %s81_s8  ;;  %s104_s16 = int_to_ptr.vmem [resolvable:$true] %s103_s16 }
  0x9c   :  { %s4632_s28 = sld [smem:[#allocation46_spill]] }
  0xa2   :  { %s3426_s13 = scalar_lea.hbm %s4632_s28, 64 }
  0xa3   :  { %p3427_p0 = scmp.ne.s32.totalorder %s4632_s28, %s3426_s13  ;;  %p3430_p1 = scmp.lt.u32.totalorder %s3426_s13, %s4632_s28 }
  0xa5   :  { %p3432_p2 = pnand %p3430_p1, %p3427_p0 }
  0xa7   :  { %3435 = shalt.err (!%p3432_p2)
}
  0xa8   :  { %s3436_s9 = scalar_lea.vmem %s82_s8, 64  ;;  %p3441_p4 = scmp.lt.s32.totalorder %s82_s8, %s82_s8 }
  0xa9   :  { %p3437_p3 = scmp.ne.s32.totalorder %s82_s8, %s3436_s9  ;;  %p3442_p5 = scmp.lt.s32.totalorder %s3436_s9, %s3436_s9 }
  0xab   :  { %p3443_p6 = por %p3442_p5, %p3441_p4 }
  0xad   :  { %p3444_p7 = pnand %p3443_p6, %p3437_p3 }
  0xaf   :  { %3447 = shalt.err (!%p3444_p7)
}
  0xb0   :  { %84 = dma.hbm_to_vmem [thread:$0]  %s4632_s28, 64, %s82_s8, [#allocation6]  }
  0xb1   :  { %s3448_s19 = scalar_lea.hbm %s4595_s10, 16 }
  0xb2   :  { %p3449_p8 = scmp.ne.s32.totalorder %s4595_s10, %s3448_s19  ;;  %p3452_p9 = scmp.lt.u32.totalorder %s3448_s19, %s4595_s10 }
  0xb4   :  { %p3454_p10 = pnand %p3452_p9, %p3449_p8 }
  0xb6   :  { %3457 = shalt.err (!%p3454_p10)
}
  0xb7   :  { %s3458_s4 = scalar_lea.vmem %s104_s16, 16  ;;  %s3462_s13 = scalar_lea.vmem %s104_s16, 32 }
  0xb8   :  { %p3459_p11 = scmp.ne.s32.totalorder %s104_s16, %s3458_s4  ;;  %p3463_p12 = scmp.lt.s32.totalorder %s104_s16, %s104_s16 }
  0xb9   :  { %p3464_p13 = scmp.lt.s32.totalorder %s3462_s13, %s3458_s4 }
  0xbb   :  { %p3465_p0 = por %p3464_p13, %p3463_p12 }
  0xbd   :  { %p3466_p1 = pnand %p3465_p0, %p3459_p11 }
  0xbf   :  { %3469 = shalt.err (!%p3466_p1)
}
  0xc0   :  { %106 = dma.hbm_to_vmem [thread:$0]  %s4595_s10, 16, %s104_s16, [#allocation9]  }
  0xc1   :  { %s3655_s11 = smov [#allocation13]   ;;  %s3656_s2 = smov [#allocation16]  }
  0xc2   :  { %s125_s29 = sshll.u32 %s3655_s11, 4  ;;  %s145_s5 = sshll.u32 %s3656_s2, 4  ;;  %s126_s29 = int_to_ptr.vmem [resolvable:$true] %s125_s29  ;;  %s146_s5 = int_to_ptr.vmem [resolvable:$true] %s145_s5 }
  0xc3   :  { %s3470_s23 = scalar_lea.hbm %s4597_s12, 16 }
  0xc4   :  { %p3471_p2 = scmp.ne.s32.totalorder %s4597_s12, %s3470_s23  ;;  %p3474_p3 = scmp.lt.u32.totalorder %s3470_s23, %s4597_s12 }
  0xc6   :  { %p3476_p4 = pnand %p3474_p3, %p3471_p2 }
  0xc8   :  { %3479 = shalt.err (!%p3476_p4)
}
  0xc9   :  { %s3480_s10 = scalar_lea.vmem %s126_s29, 16  ;;  %s3484_s16 = scalar_lea.vmem %s126_s29, 32 }
  0xca   :  { %p3481_p5 = scmp.ne.s32.totalorder %s126_s29, %s3480_s10  ;;  %p3485_p6 = scmp.lt.s32.totalorder %s126_s29, %s126_s29 }
  0xcb   :  { %p3486_p7 = scmp.lt.s32.totalorder %s3484_s16, %s3480_s10 }
  0xcd   :  { %p3487_p8 = por %p3486_p7, %p3485_p6 }
  0xcf   :  { %p3488_p9 = pnand %p3487_p8, %p3481_p5 }
  0xd1   :  { %3491 = shalt.err (!%p3488_p9)
}
  0xd2   :  { %128 = dma.hbm_to_vmem [thread:$0]  %s4597_s12, 16, %s126_s29, [#allocation12]  }
  0xd3   :  { %s3492_s13 = scalar_lea.hbm %s4599_s14, 16 }
  0xd4   :  { %p3493_p10 = scmp.ne.s32.totalorder %s4599_s14, %s3492_s13  ;;  %p3496_p11 = scmp.lt.u32.totalorder %s3492_s13, %s4599_s14 }
  0xd6   :  { %p3498_p12 = pnand %p3496_p11, %p3493_p10 }
  0xd8   :  { %3501 = shalt.err (!%p3498_p12)
}
  0xd9   :  { %s3502_s9 = scalar_lea.vmem %s146_s5, 16  ;;  %s3506_s1 = scalar_lea.vmem %s146_s5, 32 }
  0xda   :  { %p3503_p13 = scmp.ne.s32.totalorder %s146_s5, %s3502_s9  ;;  %p3507_p0 = scmp.lt.s32.totalorder %s146_s5, %s146_s5 }
  0xdb   :  { %p3508_p1 = scmp.lt.s32.totalorder %s3506_s1, %s3502_s9 }
  0xdd   :  { %p3509_p2 = por %p3508_p1, %p3507_p0 }
  0xdf   :  { %p3510_p3 = pnand %p3509_p2, %p3503_p13 }
  0xe1   :  { %3513 = shalt.err (!%p3510_p3)
}
  0xe2   :  { %148 = dma.hbm_to_vmem [thread:$0]  %s4599_s14, 16, %s146_s5, [#allocation15]  }
  0xe3   :  { %s3657_s23 = smov [#allocation19]   ;;  %s3658_s3 = smov [#allocation22]  }
  0xe4   :  { %s167_s6 = sshll.u32 %s3657_s23, 4  ;;  %s189_s19 = sshll.u32 %s3658_s3, 4  ;;  %s168_s6 = int_to_ptr.vmem [resolvable:$true] %s167_s6  ;;  %s190_s19 = int_to_ptr.vmem [resolvable:$true] %s189_s19 }
  0xe5   :  { %s3514_s16 = scalar_lea.hbm %s4602_s17, 16 }
  0xe6   :  { %p3515_p4 = scmp.ne.s32.totalorder %s4602_s17, %s3514_s16  ;;  %p3518_p5 = scmp.lt.u32.totalorder %s3514_s16, %s4602_s17 }
  0xe8   :  { %p3520_p6 = pnand %p3518_p5, %p3515_p4 }
  0xea   :  { %3523 = shalt.err (!%p3520_p6)
}
  0xeb   :  { %s3524_s14 = scalar_lea.vmem %s168_s6, 16  ;;  %s3528_s5 = scalar_lea.vmem %s168_s6, 32 }
  0xec   :  { %p3525_p7 = scmp.ne.s32.totalorder %s168_s6, %s3524_s14  ;;  %p3529_p8 = scmp.lt.s32.totalorder %s168_s6, %s168_s6 }
  0xed   :  { %p3530_p9 = scmp.lt.s32.totalorder %s3528_s5, %s3524_s14 }
  0xef   :  { %p3531_p10 = por %p3530_p9, %p3529_p8 }
  0xf1   :  { %p3532_p11 = pnand %p3531_p10, %p3525_p7 }
  0xf3   :  { %3535 = shalt.err (!%p3532_p11)
}
  0xf4   :  { %170 = dma.hbm_to_vmem [thread:$0]  %s4602_s17, 16, %s168_s6, [#allocation18]  }
  0xf5   :  { %s3536_s2 = scalar_lea.hbm %s4605_s20, 64 }
  0xf6   :  { %p3537_p12 = scmp.ne.s32.totalorder %s4605_s20, %s3536_s2  ;;  %p3540_p13 = scmp.lt.u32.totalorder %s3536_s2, %s4605_s20 }
  0xf8   :  { %p3542_p0 = pnand %p3540_p13, %p3537_p12 }
  0xfa   :  { %3545 = shalt.err (!%p3542_p0)
}
  0xfb   :  { %s3546_s23 = scalar_lea.vmem %s190_s19, 64  ;;  %p3551_p2 = scmp.lt.s32.totalorder %s190_s19, %s190_s19 }
  0xfc   :  { %p3547_p1 = scmp.ne.s32.totalorder %s190_s19, %s3546_s23  ;;  %p3552_p3 = scmp.lt.s32.totalorder %s3546_s23, %s3546_s23 }
  0xfe   :  { %p3553_p4 = por %p3552_p3, %p3551_p2 }
 0x100   :  { %p3554_p5 = pnand %p3553_p4, %p3547_p1 }
 0x102   :  { %3557 = shalt.err (!%p3554_p5)
}
 0x103   :  { %192 = dma.hbm_to_vmem [thread:$0]  %s4605_s20, 64, %s190_s19, [#allocation21]  }
 0x104   :  { %s3659_s3 = smov [#allocation23]   ;;  %s3558_s26 = scalar_lea.hbm %s4607_s22, 16 }
 0x105   :  { %s201_s30 = sshll.u32 %s3659_s3, 4  ;;  %p3559_p6 = scmp.ne.s32.totalorder %s4607_s22, %s3558_s26  ;;  %s202_s30 = int_to_ptr.vmem [resolvable:$true] %s201_s30 }
 0x106   :  { %p3562_p7 = scmp.lt.u32.totalorder %s3558_s26, %s4607_s22 }
 0x108   :  { %p3564_p8 = pnand %p3562_p7, %p3559_p6 }
 0x10a   :  { %3567 = shalt.err (!%p3564_p8)
}
 0x10b   :  { %s3568_s5 = scalar_lea.vmem %s202_s30, 16  ;;  %s3572_s20 = scalar_lea.vmem %s202_s30, 32 }
 0x10c   :  { %p3569_p9 = scmp.ne.s32.totalorder %s202_s30, %s3568_s5  ;;  %p3573_p10 = scmp.lt.s32.totalorder %s202_s30, %s202_s30 }
 0x10d   :  { %p3574_p11 = scmp.lt.s32.totalorder %s3572_s20, %s3568_s5 }
 0x10f   :  { %p3575_p12 = por %p3574_p11, %p3573_p10 }
 0x111   :  { %p3576_p13 = pnand %p3575_p12, %p3569_p9 }
 0x113   :  { %3579 = shalt.err (!%p3576_p13)
}
 0x114   :  { %204 = dma.hbm_to_vmem [thread:$0]  %s4607_s22, 16, %s202_s30, [#allocation24]  }
 0x115   :  { %3624 = dma.done.wait [#allocation3], 1536  }
 0x116   :  { %3625 = vsyncadd [#allocation3], 4294965760 }
 0x117   :  { %3626 = dma.done.wait [#allocation6], 80  }
 0x118   :  { %3627 = vsyncadd [#allocation6], 4294967216 }
 0x119   :  { %3628 = dma.done.wait [#allocation9], 1040  }
 0x11a   :  { %3629 = vsyncadd [#allocation9], 4294966256 }
 0x11b   :  { %3630 = dma.done.wait [#allocation12], 1040  }
 0x11c   :  { %3631 = vsyncadd [#allocation12], 4294966256 }
 0x11d   :  { %3632 = dma.done.wait [#allocation15], 32  }
 0x11e   :  { %3633 = vsyncadd [#allocation15], 4294967264 }
 0x11f   :  { %3634 = dma.done.wait [#allocation18], 32  }
 0x120   :  { %3635 = vsyncadd [#allocation18], 4294967264 }
 0x121   :  { %3636 = dma.done.wait [#allocation21], 128  }
 0x122   :  { %3637 = vsyncadd [#allocation21], 4294967168 }
 0x123   :  { %3638 = dma.done.wait [#allocation24], 16  }
 0x124   :  { %3639 = vsyncadd [#allocation24], 4294967280  ;;  %v3660_v0 = vmov 0   ;;  %v3034_v1 = vld [vmem:[#allocation2] sm:$0xff]   ;;  %v3035_v2 = vld [vmem:[#allocation2 + $0x8] sm:$0xff]   ;;  %vm364_vm0 = vcmask 523264  }
 0x125   :  { %368 = vmatprep.subr.bf16.mxu0 %v3660_v0  ;;  %707 = vmatprep.mubr.bf16.mxu1 %v3660_v0  ;;  %v3036_v3 = vld [vmem:[#allocation2 + $0x10] sm:$0xff]   ;;  %v3037_v4 = vld [vmem:[#allocation2 + $0x18] sm:$0xff]   ;;  %v3038_v5 = vld [vmem:[#allocation2 + $0x20] sm:$0xff]   ;;  %s4633_s28 = sld [smem:[#allocation38_spill]]  ;;  %s4634_s12 = sld [smem:[#allocation42_spill]]  ;;  %vm3662_vm1 = vmmov 0  }
 0x126   :  { %369 = vmatpush1.bf16.msra.mxu0 %v3034_v1  ;;  %v3039_v7 = vld [vmem:[#allocation2 + $0x28] sm:$0xff]   ;;  %v3040_v8 = vld [vmem:[#allocation2 + $0x30] sm:$0xff]   ;;  %v3041_v9 = vld [vmem:[#allocation2 + $0x38] sm:$0xff]   ;;  %s4635_s17 = sld [smem:[#allocation45_spill]]  ;;  %s4636_s5 = sld [smem:[#allocation43_spill]]  ;;  %vm780_vm2 = vcmask 261120  }
 0x127   :  { %370 = vmatprep.subr.bf16.mxu0 %v3660_v0  ;;  %v3042_v10 = vld [vmem:[#allocation2 + $0x40] sm:$0xff]   ;;  %v3043_v11 = vld [vmem:[#allocation2 + $0x48] sm:$0xff]   ;;  %v3044_v12 = vld [vmem:[#allocation2 + $0x50] sm:$0xff]   ;;  %s4637_s2 = sld [smem:[#allocation40_spill]]  ;;  %vm828_vm3 = vcmask 130048   ;;  %s3664_s29 = smov 32  }
 0x128   :  { %v3045_v13 = vld [vmem:[#allocation2 + $0x58] sm:$0xff]   ;;  %v2656_v56 = vld [vmem:[#allocation5] ss:$0 sm:$0xff]  ;;  %vm1843_vm4 = vcmask 1040384   ;;  %vm2162_vm5 = vcmask 1041408   ;;  %s3667_s4 = smov [#allocation26]  }
 0x129   :  { %s2617_s14 = sshll.u32 %s3667_s4, 4  ;;  %s2618_s14 = int_to_ptr.vmem [resolvable:$true] %s2617_s14 }
 0x12a   :  { %371 = vmatpush1.bf16.msra.mxu0 %v3035_v2 }
 0x12b   :  { %372 = vmatprep.subr.bf16.mxu0 %v3660_v0  ;;  %v3048_v6 = vld [vmem:[%s4633_s28 + $0x4] ss:$8 sps:$4 sm:$0xff]   ;;  %v3046_v14 = vld [vmem:[%s4633_s28] ss:$8 sps:$4 sm:$0xff]  }
 0x12c   :  { %2654 = vmatprep.mubr.msk.bf16.mxu0 %vm364_vm0, %v3048_v6  ;;  %v2639_v15 = vld [vmem:[%s4634_s12] ss:$0 sm:$0xff]  ;;  %v3049_v30 = vld [vmem:[%s4635_s17 + $0x4] ss:$16 sps:$4 sm:$0xff]   ;;  %v3075_v46 = vld [vmem:[%s4635_s17 + $0xc] ss:$16 sps:$4 sm:$0xff]  }
 0x12d   :  { %v3051_v31 = vld [vmem:[%s4635_s17] ss:$16 sps:$4 sm:$0xff]   ;;  %675 = vmatprep.subr.bf16.mxu1 %v3049_v30  ;;  %v3052_v32 = vld [vmem:[%s4635_s17 + $0x24] ss:$16 sps:$4 sm:$0xff]   ;;  %s3663_s12 = smov 96  }
 0x12e   :  { %373 = vmatpush1.bf16.msra.mxu0 %v3036_v3  ;;  %676 = vmatpush1.bf16.msra.mxu1 %v3051_v31  ;;  %v3054_v33 = vld [vmem:[%s4635_s17 + $0x20] ss:$16 sps:$4 sm:$0xff]   ;;  %v3055_v34 = vld [vmem:[%s4635_s17 + $0x44] ss:$16 sps:$4 sm:$0xff]  }
 0x12f   :  { %374 = vmatprep.subr.bf16.mxu0 %v3660_v0  ;;  %677 = vmatprep.subr.bf16.mxu1 %v3052_v32  ;;  %v3057_v35 = vld [vmem:[%s4635_s17 + $0x40] ss:$16 sps:$4 sm:$0xff]   ;;  %v3058_v36 = vld [vmem:[%s4635_s17 + $0x64] ss:$16 sps:$4 sm:$0xff]  }
 0x130   :  { %v3060_v37 = vld [vmem:[%s4635_s17 + $0x60] ss:$16 sps:$4 sm:$0xff]   ;;  %v3061_v38 = vld [vmem:[%s4635_s17 + $0x84] ss:$16 sps:$4 sm:$0xff]  }
 0x131   :  { %v3063_v39 = vld [vmem:[%s4635_s17 + $0x80] ss:$16 sps:$4 sm:$0xff]   ;;  %v3064_v40 = vld [vmem:[%s4635_s17 + $0xa4] ss:$16 sps:$4 sm:$0xff]  }
 0x132   :  { %375 = vmatpush1.bf16.msra.mxu0 %v3037_v4  ;;  %678 = vmatpush1.bf16.msra.mxu1 %v3054_v33  ;;  %v3066_v41 = vld [vmem:[%s4635_s17 + $0xa0] ss:$16 sps:$4 sm:$0xff]   ;;  %v3067_v42 = vld [vmem:[%s4635_s17 + $0xc4] ss:$16 sps:$4 sm:$0xff]  }
 0x133   :  { %376 = vmatprep.subr.bf16.mxu0 %v3660_v0  ;;  %679 = vmatprep.subr.bf16.mxu1 %v3055_v34  ;;  %v3069_v43 = vld [vmem:[%s4635_s17 + $0xc0] ss:$16 sps:$4 sm:$0xff]   ;;  %v3070_v44 = vld [vmem:[%s4635_s17 + $0xe4] ss:$16 sps:$4 sm:$0xff]  }
 0x134   :  { %v3072_v45 = vld [vmem:[%s4635_s17 + $0xe0] ss:$16 sps:$4 sm:$0xff]  }
 0x135   :  { %v2655_v54 = vld [vmem:[%s4636_s5] ss:$0 sm:$0xff]  ;;  %v4116_v30 = vld [vmem:[#allocation7] sm:$0xf] }
 0x136   :  { %377 = vmatpush1.bf16.msra.mxu0 %v3038_v5  ;;  %680 = vmatpush1.bf16.msra.mxu1 %v3057_v35 }
 0x137   :  { %378 = vmatprep.subr.bf16.mxu0 %v3660_v0  ;;  %681 = vmatprep.subr.bf16.mxu1 %v3058_v36 }
 0x13a   :  { %379 = vmatpush1.bf16.msra.mxu0 %v3039_v7  ;;  %682 = vmatpush1.bf16.msra.mxu1 %v3060_v37 }
 0x13b   :  { %380 = vmatprep.subr.bf16.mxu0 %v3660_v0  ;;  %683 = vmatprep.subr.bf16.mxu1 %v3061_v38 }
 0x13e   :  { %381 = vmatpush1.bf16.msra.mxu0 %v3040_v8  ;;  %684 = vmatpush1.bf16.msra.mxu1 %v3063_v39 }
 0x13f   :  { %382 = vmatprep.subr.bf16.mxu0 %v3660_v0  ;;  %685 = vmatprep.subr.bf16.mxu1 %v3064_v40 }
 0x142   :  { %383 = vmatpush1.bf16.msra.mxu0 %v3041_v9  ;;  %686 = vmatpush1.bf16.msra.mxu1 %v3066_v41 }
 0x143   :  { %384 = vmatprep.subr.bf16.mxu0 %v3660_v0  ;;  %687 = vmatprep.subr.bf16.mxu1 %v3067_v42 }
 0x146   :  { %385 = vmatpush1.bf16.msra.mxu0 %v3042_v10  ;;  %688 = vmatpush1.bf16.msra.mxu1 %v3069_v43  ;;  %v3073_v10 = vld [vmem:[%s4635_s17 + $0x8] ss:$16 sps:$4 sm:$0xff]  }
 0x147   :  { %386 = vmatprep.subr.bf16.mxu0 %v3660_v0  ;;  %689 = vmatprep.subr.bf16.mxu1 %v3070_v44 }
 0x14a   :  { %387 = vmatpush1.bf16.msra.mxu0 %v3043_v11  ;;  %690 = vmatpush1.bf16.msra.mxu1 %v3072_v45 }
 0x14b   :  { %388 = vmatprep.subr.bf16.mxu0 %v3660_v0  ;;  %718 = vmatprep.subr.bf16.mxu1 %v3075_v46 }
 0x14e   :  { %389 = vmatpush1.bf16.msra.mxu0 %v3044_v12  ;;  %v3078_v12 = vld [vmem:[%s4635_s17 + $0x2c] ss:$16 sps:$4 sm:$0xff]  }
 0x14f   :  { %390 = vmatprep.subr.bf16.mxu0 %v3660_v0 }
 0x152   :  { %391 = vmatpush1.bf16.msra.mxu0 %v3045_v13  ;;  %v3076_v13 = vld [vmem:[%s4635_s17 + $0x28] ss:$16 sps:$4 sm:$0xff]  }
 0x155   :  { %401 = vmatmul.mubr.bf16.vlgmr.msra.gmra.mrb[0].mxu0 %v3046_v14  ;;  %v3081_v14 = vld [vmem:[%s4635_s17 + $0x4c] ss:$16 sps:$4 sm:$0xff]  }
 0x228   :  { %v402_v16 = vpop.f32.mrb[0].mxu0 }
 0x229   :  { %v403_v17 = vadd.f32 %v2639_v15, %v402_v16  ;;  %v404_v18 = vpop.f32.mrb[1].mxu0  ;;  %v3084_v16 = vld [vmem:[%s4635_s17 + $0x6c] ss:$16 sps:$4 sm:$0xff]  }
 0x22a   :  { %v405_v19 = vpop.f32.mrb[2].mxu0  ;;  %v3087_v18 = vld [vmem:[%s4635_s17 + $0x8c] ss:$16 sps:$4 sm:$0xff]  }
 0x22b   :  { %v407_v20 = vpop.f32.mrb[3].mxu0  ;;  %411 = vadd.xlane.f32.xlu0 %v403_v17  ;;  %v406_v21 = vadd.f32 %v2639_v15, %v405_v19  ;;  %v3079_v15 = vld [vmem:[%s4635_s17 + $0x48] ss:$16 sps:$4 sm:$0xff]  }
 0x22c   :  { %v3085_v19 = vld [vmem:[%s4635_s17 + $0x88] ss:$16 sps:$4 sm:$0xff]   ;;  %v3090_v20 = vld [vmem:[%s4635_s17 + $0xac] ss:$16 sps:$4 sm:$0xff]  }
 0x22f   :  { %413 = vadd.xlane.f32.xlu0 %v406_v21 }
 0x2b8   :  { %v412_v22 = vpop.xlane.xlu0 %411 }
 0x2b9   :  { %v416_v23 = vmul.f32 0.0078125, %v412_v22  ;;  %v3093_v22 = vld [vmem:[%s4635_s17 + $0xcc] ss:$16 sps:$4 sm:$0xff]  }
 0x2bb   :  { %v418_v24 = vsub.f32 %v403_v17, %v416_v23  ;;  %v3082_v17 = vld [vmem:[%s4635_s17 + $0x68] ss:$16 sps:$4 sm:$0xff]  }
 0x2bc   :  { %v414_v25 = vpop.xlane.xlu0 %413  ;;  %v3091_v23 = vld [vmem:[%s4635_s17 + $0xc8] ss:$16 sps:$4 sm:$0xff]  }
 0x2bd   :  { %v417_v26 = vmul.f32 0.0078125, %v414_v25  ;;  %v420_v27 = vmul.f32 %v418_v24, %v418_v24  ;;  %v3094_v25 = vld [vmem:[%s4635_s17 + $0xe8] ss:$16 sps:$4 sm:$0xff]  }
 0x2bf   :  { %v419_v28 = vsub.f32 %v406_v21, %v417_v26  ;;  %422 = vadd.xlane.f32.xlu1 %v420_v27  ;;  %v3088_v21 = vld [vmem:[%s4635_s17 + $0xa8] ss:$16 sps:$4 sm:$0xff]   ;;  %v3661_v26 = vmov 0.0   ;;  %v495_v27 = vlaneseq }
 0x2c0   :  { %2888 = vmatprep.subr.bf16.mxu0 %v3661_v26  ;;  %2890 = vmatprep.mubr.msk.bf16.mxu0 %vm3662_vm1, %v3661_v26 }
 0x2c1   :  { %v421_v29 = vmul.f32 %v419_v28, %v419_v28 }
 0x2c3   :  { %424 = vadd.xlane.f32.xlu1 %v421_v29 }
 0x34c   :  { %v423_v47 = vpop.xlane.xlu1 %422 }
 0x34d   :  { %v426_v48 = vmul.f32 0.0078125, %v423_v47 }
 0x34f   :  { %v428_v49 = vadd.f32 1e-05, %v426_v48 }
 0x350   :  { %v425_v50 = vpop.xlane.xlu1 %424 }
 0x351   :  { %3202 = vrsqrt.f32 %v428_v49  ;;  %v427_v51 = vmul.f32 0.0078125, %v425_v50 }
 0x353   :  { %v429_v52 = vadd.f32 1e-05, %v427_v51 }
 0x355   :  { %3204 = vrsqrt.f32 %v429_v52 }
 0x35b   :  { %v3203_v53 = vpop.eup %3202 }
 0x35c   :  { %v432_v55 = vmul.f32 %v3203_v53, %v418_v24  ;;  %v3096_v24 = vld [vmem:[%s4635_s17 + $0xec] ss:$16 sps:$4 sm:$0xff]  }
 0x35e   :  { %v440_v57 = vmul.f32 %v2655_v54, %v432_v55 }
 0x35f   :  { %v3205_v58 = vpop.eup %3204 }
 0x360   :  { %v433_v59 = vmul.f32 %v3205_v58, %v419_v28  ;;  %v448_v60 = vadd.f32 %v2656_v56, %v440_v57  ;;  %v4111_v28 = vshrl.u32 %v495_v27, 7 }
 0x362   :  { %v441_v61 = vmul.f32 %v2655_v54, %v433_v59  ;;  %v452_v62 = vmul.f32 0.70710677, %v448_v60  ;;  %v450_v5 = vmul.f32 0.5, %v448_v60  ;;  %v4114_v29 = vsub.s32 0, %v4111_v28  ;;  %v4152_v54 = vld [vmem:[%s4637_s2] sm:$0xff] }
 0x363   :  { %v4119_v31 = vsub.s32 1, %v4111_v28  ;;  %v4137_v45 = vsub.s32 2, %v4111_v28 }
 0x364   :  { %v449_v63 = vadd.f32 %v2656_v56, %v441_v61  ;;  %3206 = verf.f32 %v452_v62  ;;  %v498_v32 = vrot.slane %v4116_v30, %v4114_v29  ;;  %v4157_v56 = vld [vmem:[%s4637_s2 + $0x8] sm:$0xff] }
 0x365   :  { %v502_v34 = vrot.slane %v4116_v30, %v4119_v31  ;;  %v506_v46 = vrot.slane %v4116_v30, %v4137_v45 }
 0x366   :  { %v453_v1 = vmul.f32 0.70710677, %v449_v63  ;;  %v451_v6 = vmul.f32 0.5, %v449_v63 }
 0x368   :  { %3208 = verf.f32 %v453_v1 }
 0x36e   :  { %v3207_v2 = vpop.eup %3206 }
 0x36f   :  { %v456_v3 = vadd.f32 1.0, %v3207_v2 }
 0x371   :  { %v4053_v8 = vmul.f32 %v456_v3, %v450_v5 }
 0x372   :  { %v3209_v4 = vpop.eup %3208 }
 0x373   :  { %v457_v7 = vadd.f32 1.0, %v3209_v4 }
 0x375   :  { %v4055_v9 = vmul.f32 %v457_v7, %v451_v6 }
 0x377   :  { %v460_v11 = vpack.c.bf16 %v4055_v9, %v4053_v8 }
 0x379   :  { %708 = vmatmul.mubr.bf16.vlgmr.msra.gmra.mrb[0].mxu1 %v460_v11 }
 0x37a   :  { %719 = vmatpush1.bf16.msra.mxu1 %v3073_v10  ;;  %750 = vmatprep.mubr.bf16.mxu1 %v3660_v0 }
 0x37b   :  { %720 = vmatprep.subr.bf16.mxu1 %v3078_v12 }
 0x37e   :  { %721 = vmatpush1.bf16.msra.mxu1 %v3076_v13 }
 0x37f   :  { %722 = vmatprep.subr.bf16.mxu1 %v3081_v14 }
 0x382   :  { %723 = vmatpush1.bf16.msra.mxu1 %v3079_v15 }
 0x383   :  { %724 = vmatprep.subr.bf16.mxu1 %v3084_v16 }
 0x386   :  { %725 = vmatpush1.bf16.msra.mxu1 %v3082_v17 }
 0x387   :  { %726 = vmatprep.subr.bf16.mxu1 %v3087_v18 }
 0x38a   :  { %727 = vmatpush1.bf16.msra.mxu1 %v3085_v19 }
 0x38b   :  { %728 = vmatprep.subr.bf16.mxu1 %v3090_v20 }
 0x38e   :  { %729 = vmatpush1.bf16.msra.mxu1 %v3088_v21 }
 0x38f   :  { %730 = vmatprep.subr.bf16.mxu1 %v3093_v22 }
 0x392   :  { %731 = vmatpush1.bf16.msra.mxu1 %v3091_v23 }
 0x393   :  { %732 = vmatprep.subr.bf16.mxu1 %v3096_v24 }
 0x396   :  { %733 = vmatpush1.bf16.msra.mxu1 %v3094_v25 }
 0x397   :  { %2906 = vmatprep.subr.bf16.mxu1 %v3661_v26 }
 0x399   :  { %751 = vmatmul.mubr.bf16.vlgmr.msra.gmra.mrb[4].mxu1 %v460_v11 }
 0x39a   :  { %2908 = vmatprep.mubr.msk.bf16.mxu1 %vm3662_vm1, %v3661_v26 }
 0x44c   :  { %v709_v33 = vpop.f32.mrb[0].mxu1 }
 0x44d   :  { %v711_v35 = vpop.f32.mrb[1].mxu1  ;;  %v710_v37 = vadd.f32 %v709_v33, %v498_v32 }
 0x44e   :  { %v713_v36 = vpop.f32.mrb[2].mxu1  ;;  %v712_v40 = vadd.f32 %v711_v35, %v502_v34 }
 0x44f   :  { %v714_v38 = vadd.f32 %v713_v36, %v498_v32  ;;  %v715_v39 = vpop.f32.mrb[3].mxu1 }
 0x450   :  { %v716_v41 = vadd.f32 %v715_v39, %v502_v34 }
 0x451   :  { %v4125_v42 = vpack.c.bf16 %v714_v38, %v710_v37 }
 0x452   :  { %v4127_v43 = vpack.c.bf16 %v716_v41, %v712_v40 }
 0x454   :  { %v785_v44 = vsel %vm780_vm2, %v4127_v43, 0 }
 0x455   :  { %2889 = vmatpush3.bf16.xpose.msra.mxu0 %v785_v44 }
 0x456   :  { %2894 = vmatprep.subr.bf16.mxu0 %v3661_v26 }
 0x45c   :  { %2891 = vmatmul.mubr.msk.bf16.vlgmr.msra.gmra.mrb[4].mxu0 %vm780_vm2, %v4125_v42 }
 0x45d   :  { %2896 = vmatprep.mubr.msk.bf16.mxu0 %vm3662_vm1, %v3661_v26 }
 0x46c   :  { %v752_v47 = vpop.f32.mrb[4].mxu1 }
 0x46d   :  { %v4141_v48 = vpop.f32.mrb[5].mxu1  ;;  %v753_v50 = vadd.f32 %v752_v47, %v506_v46 }
 0x46e   :  { %v756_v49 = vpop.f32.mrb[6].mxu1 }
 0x46f   :  { %v757_v51 = vadd.f32 %v756_v49, %v506_v46  ;;  %v4143_v52 = vpop.f32.mrb[7].mxu1 }
 0x471   :  { %v4145_v53 = vpack.c.bf16 %v757_v51, %v753_v50 }
 0x473   :  { %2895 = vmatpush3.bf16.msra.mxu0 %v4145_v53 }
 0x474   :  { %2900 = vmatprep.subr.bf16.mxu0 %v3661_v26 }
 0x52f   :  { %v821_v55 = vpop.f32.mrb[4].mxu0 }
 0x530   :  { %v822_v57 = vadd.f32 %v821_v55, %v4152_v54  ;;  %v2892_v58 = vpop.f32.mrb[5].mxu0 }
 0x531   :  { %v824_v59 = vpop.f32.mrb[6].mxu0 }
 0x532   :  { %v825_v60 = vadd.f32 %v824_v59, %v4157_v56  ;;  %v2893_v61 = vpop.f32.mrb[7].mxu0  ;;  %v829_v62 = vsel %vm828_vm3, %v822_v57, -inf  ;;  %v3099_v59 = vld [vmem:[#allocation8 + $0x10] sm:$0xff]  }
 0x533   :  { %830 = vmax.xlane.f32.xlu0 %v829_v62 }
 0x534   :  { %v832_v63 = vsel %vm828_vm3, %v825_v60, -inf }
 0x535   :  { %833 = vmax.xlane.f32.xlu1 %v832_v63 }
 0x5c0   :  { %v831_v1 = vpop.xlane.xlu0 %830 }
 0x5c1   :  { %v835_v2 = vsub.f32 %v822_v57, %v831_v1 }
 0x5c2   :  { %v834_v3 = vpop.xlane.xlu1 %833 }
 0x5c3   :  { %v837_v4 = vmul.f32 1.442695, %v835_v2  ;;  %v836_v5 = vsub.f32 %v825_v60, %v834_v3  ;;  %v3100_v60 = vld [vmem:[#allocation8 + $0x18] sm:$0xff]  }
 0x5c5   :  { %3210 = vpow2.f32 %v837_v4  ;;  %v839_v6 = vmul.f32 1.442695, %v836_v5  ;;  %v3097_v5 = vld [vmem:[#allocation8] sm:$0xff]  }
 0x5c7   :  { %3212 = vpow2.f32 %v839_v6 }
 0x5cf   :  { %v3211_v7 = vpop.eup %3210 }
 0x5d0   :  { %v841_v10 = vsel %vm828_vm3, %v3211_v7, 0.0 }
 0x5d1   :  { %v3213_v11 = vpop.eup %3212  ;;  %842 = vadd.xlane.f32.xlu0 %v841_v10 }
 0x5d2   :  { %v844_v12 = vsel %vm828_vm3, %v3213_v11, 0.0 }
 0x5d3   :  { %845 = vadd.xlane.f32.xlu1 %v844_v12 }
 0x5e4   :  { %898 = vrot.lane.b32.xlu1 %v4125_v42, %s3663_s12 }
 0x5e7   :  { %901 = vrot.lane.b32.xlu0 %v4127_v43, %s3663_s12 }
 0x65e   :  { %v843_v13 = vpop.xlane.xlu0 %842 }
 0x65f   :  { %3214 = vrcp.f32 %v843_v13 }
 0x660   :  { %v846_v14 = vpop.xlane.xlu1 %845 }
 0x661   :  { %3216 = vrcp.f32 %v846_v14 }
 0x662   :  { %v902_v19 = vpop.permute.xlu0 %901 }
 0x663   :  { %v907_v21 = vsel %vm780_vm2, %v902_v19, 0 }
 0x664   :  { %v899_v22 = vpop.permute.xlu1 %898 }
 0x669   :  { %v3215_v15 = vpop.eup %3214 }
 0x66a   :  { %v849_v17 = vmul.f32 %v3215_v15, %v3211_v7  ;;  %v3098_v7 = vld [vmem:[#allocation8 + $0x8] sm:$0xff]  }
 0x66b   :  { %v3217_v16 = vpop.eup %3216 }
 0x66c   :  { %v850_v18 = vmul.f32 %v3217_v16, %v3213_v11 }
 0x66e   :  { %v851_v20 = vpack.c.bf16 %v850_v18, %v849_v17 }
 0x670   :  { %2897 = vmatmul.mubr.msk.bf16.vlgmr.msra.gmra.mrb[8].mxu0 %vm828_vm3, %v851_v20 }
 0x671   :  { %2901 = vmatpush3.bf16.xpose.msra.mxu0 %v907_v21  ;;  %2902 = vmatprep.mubr.msk.bf16.mxu0 %vm3662_vm1, %v3661_v26 }
 0x672   :  { %2912 = vmatprep.subr.bf16.mxu0 %v3661_v26 }
 0x678   :  { %2903 = vmatmul.mubr.msk.bf16.vlgmr.msra.gmra.mrb[12].mxu0 %vm780_vm2, %v899_v22 }
 0x679   :  { %2916 = vmatprep.mubr.msk.bf16.mxu0 %vm3662_vm1, %v3661_v26  ;;  %2913 = vmatpush3.bf16.msra.mxu0 %v3099_v59 }
 0x67a   :  { %2914 = vmatprep.subr.bf16.mxu0 %v3661_v26 }
 0x67d   :  { %2915 = vmatpush3.bf16.msra.mxu0 %v3100_v60 }
 0x67e   :  { %2928 = vmatprep.subr.bf16.mxu0 %v3661_v26 }
 0x743   :  { %v889_v23 = vpop.f32.mrb[8].mxu0 }
 0x744   :  { %v2898_v24 = vpop.f32.mrb[9].mxu0 }
 0x745   :  { %v892_v25 = vpop.f32.mrb[10].mxu0 }
 0x746   :  { %v896_v27 = vpack.c.bf16 %v892_v25, %v889_v23  ;;  %v2899_v32 = vpop.f32.mrb[11].mxu0 }
 0x74b   :  { %v943_v33 = vpop.f32.mrb[12].mxu0 }
 0x74c   :  { %v944_v34 = vadd.f32 %v943_v33, %v4152_v54  ;;  %v2904_v35 = vpop.f32.mrb[13].mxu0 }
 0x74d   :  { %v946_v36 = vpop.f32.mrb[14].mxu0 }
 0x74e   :  { %v947_v37 = vadd.f32 %v946_v36, %v4157_v56  ;;  %v2905_v38 = vpop.f32.mrb[15].mxu0  ;;  %v950_v39 = vsel %vm828_vm3, %v944_v34, -inf }
 0x74f   :  { %951 = vmax.xlane.f32.xlu1 %v950_v39 }
 0x750   :  { %v953_v40 = vsel %vm828_vm3, %v947_v37, -inf }
 0x751   :  { %954 = vmax.xlane.f32.xlu0 %v953_v40 }
 0x7dc   :  { %v952_v41 = vpop.xlane.xlu1 %951 }
 0x7dd   :  { %v956_v44 = vsub.f32 %v944_v34, %v952_v41 }
 0x7de   :  { %v955_v46 = vpop.xlane.xlu0 %954 }
 0x7df   :  { %v958_v47 = vmul.f32 1.442695, %v956_v44  ;;  %v957_v49 = vsub.f32 %v947_v37, %v955_v46 }
 0x7e1   :  { %3218 = vpow2.f32 %v958_v47  ;;  %v960_v50 = vmul.f32 1.442695, %v957_v49 }
 0x7e3   :  { %3220 = vpow2.f32 %v960_v50 }
 0x7eb   :  { %v3219_v51 = vpop.eup %3218 }
 0x7ec   :  { %v962_v55 = vsel %vm828_vm3, %v3219_v51, 0.0 }
 0x7ed   :  { %v3221_v57 = vpop.eup %3220  ;;  %963 = vadd.xlane.f32.xlu0 %v962_v55 }
 0x7ee   :  { %v965_v58 = vsel %vm828_vm3, %v3221_v57, 0.0 }
 0x7ef   :  { %966 = vadd.xlane.f32.xlu1 %v965_v58 }
 0x800   :  { %1136 = vrot.lane.b32.xlu1 %v4127_v43, %s3647_s7 }
 0x803   :  { %974 = vrot.lane.b32.xlu0 %v4145_v53, %s3663_s12 }
 0x804   :  { %1134 = vrot.lane.b32.xlu1 %v4125_v42, %s3647_s7 }
 0x87a   :  { %v964_v61 = vpop.xlane.xlu0 %963 }
 0x87b   :  { %3222 = vrcp.f32 %v964_v61 }
 0x87c   :  { %v967_v62 = vpop.xlane.xlu1 %966 }
 0x87d   :  { %3224 = vrcp.f32 %v967_v62 }
 0x87e   :  { %v975_v63 = vpop.permute.xlu0 %974 }
 0x87f   :  { %2907 = vmatpush3.bf16.msra.mxu1 %v975_v63 }
 0x880   :  { %2920 = vmatprep.subr.bf16.mxu1 %v3661_v26  ;;  %v1137_v12 = vpop.permute.xlu1 %1136 }
 0x881   :  { %v1142_v16 = vsel %vm780_vm2, %v1137_v12, 0 }
 0x884   :  { %v1135_v21 = vpop.permute.xlu1 %1134 }
 0x885   :  { %v3223_v1 = vpop.eup %3222 }
 0x886   :  { %v970_v3 = vmul.f32 %v3223_v1, %v3219_v51 }
 0x887   :  { %v3225_v2 = vpop.eup %3224 }
 0x888   :  { %v971_v4 = vmul.f32 %v3225_v2, %v3221_v57 }
 0x88a   :  { %v972_v6 = vpack.c.bf16 %v971_v4, %v970_v3 }
 0x88c   :  { %2909 = vmatmul.mubr.msk.bf16.vlgmr.msra.gmra.mrb[8].mxu1 %vm828_vm3, %v972_v6  ;;  %v3102_v6 = vld [vmem:[#allocation8 + $0x28] sm:$0xff]  }
 0x88d   :  { %2921 = vmatpush3.bf16.msra.mxu1 %v3097_v5  ;;  %2924 = vmatprep.mubr.msk.bf16.mxu1 %vm3662_vm1, %v3661_v26 }
 0x88e   :  { %2922 = vmatprep.subr.bf16.mxu1 %v3661_v26 }
 0x891   :  { %2923 = vmatpush3.bf16.msra.mxu1 %v3098_v7 }
 0x892   :  { %2934 = vmatprep.subr.bf16.mxu1 %v3661_v26 }
 0x894   :  { %2925 = vmatmul.mubr.msk.bf16.vlgmr.msra.gmra.mrb[12].mxu1 %vm780_vm2, %v896_v27 }
 0x895   :  { %2936 = vmatprep.mubr.msk.bf16.mxu1 %vm3662_vm1, %v3661_v26 }
 0x95f   :  { %v1014_v10 = vpop.f32.mrb[8].mxu1 }
 0x960   :  { %v2910_v11 = vpop.f32.mrb[9].mxu1 }
 0x961   :  { %v1017_v13 = vpop.f32.mrb[10].mxu1 }
 0x962   :  { %v1021_v14 = vpack.c.bf16 %v1017_v13, %v1014_v10  ;;  %v2911_v15 = vpop.f32.mrb[11].mxu1 }
 0x964   :  { %2917 = vmatmul.mubr.msk.bf16.vlgmr.msra.gmra.mrb[16].mxu0 %vm780_vm2, %v1021_v14 }
 0x965   :  { %2929 = vmatpush3.bf16.xpose.msra.mxu0 %v1142_v16  ;;  %2930 = vmatprep.mubr.msk.bf16.mxu0 %vm3662_vm1, %v3661_v26 }
 0x966   :  { %2940 = vmatprep.subr.bf16.mxu0 %v3661_v26 }
 0x967   :  { %v1127_v17 = vpop.f32.mrb[12].mxu1 }
 0x968   :  { %v2926_v18 = vpop.f32.mrb[13].mxu1 }
 0x969   :  { %v1130_v19 = vpop.f32.mrb[14].mxu1 }
 0x96a   :  { %v2927_v20 = vpop.f32.mrb[15].mxu1 }
 0x96c   :  { %2931 = vmatmul.mubr.msk.bf16.vlgmr.msra.gmra.mrb[20].mxu0 %vm780_vm2, %v1135_v21 }
 0x96d   :  { %2944 = vmatprep.mubr.msk.bf16.mxu0 %vm3662_vm1, %v3661_v26 }
 0xa37   :  { %v1071_v22 = vpop.f32.mrb[16].mxu0 }
 0xa38   :  { %v4208_v23 = vadd.f32 %v1127_v17, %v1071_v22  ;;  %v2918_v24 = vpop.f32.mrb[17].mxu0 }
 0xa39   :  { %v1074_v25 = vpop.f32.mrb[18].mxu0 }
 0xa3a   :  { %v4210_v27 = vadd.f32 %v1130_v19, %v1074_v25  ;;  %v2919_v32 = vpop.f32.mrb[19].mxu0 }
 0xa3f   :  { %v1178_v33 = vpop.f32.mrb[20].mxu0 }
 0xa40   :  { %v1179_v34 = vadd.f32 %v1178_v33, %v4152_v54  ;;  %v2932_v35 = vpop.f32.mrb[21].mxu0 }
 0xa41   :  { %v1181_v36 = vpop.f32.mrb[22].mxu0 }
 0xa42   :  { %v1182_v37 = vadd.f32 %v1181_v36, %v4157_v56  ;;  %v2933_v38 = vpop.f32.mrb[23].mxu0  ;;  %v1185_v39 = vsel %vm828_vm3, %v1179_v34, -inf }
 0xa43   :  { %1186 = vmax.xlane.f32.xlu1 %v1185_v39 }
 0xa44   :  { %v1188_v40 = vsel %vm828_vm3, %v1182_v37, -inf }
 0xa45   :  { %1189 = vmax.xlane.f32.xlu0 %v1188_v40 }
 0xa54   :  { %1208 = vrot.lane.b32.xlu1 %v4145_v53, %s3647_s7  ;;  %s4638_s7 = sld [smem:[#allocation39_spill]] }
 0xa58   :  { %1314 = vrot.lane.b32.xlu1 %v4125_v42, %s3664_s29  ;;  %v3101_v42 = vld [vmem:[#allocation8 + $0x20] sm:$0xff]  }
 0xa59   :  { %2941 = vmatpush3.bf16.msra.mxu0 %v3101_v42  ;;  %v3107_v42 = vld [vmem:[#allocation11 + $0x10] sm:$0xff]  }
 0xa5a   :  { %2942 = vmatprep.subr.bf16.mxu0 %v3661_v26 }
 0xa5d   :  { %2943 = vmatpush3.bf16.msra.mxu0 %v3102_v6 }
 0xa5e   :  { %2954 = vmatprep.subr.bf16.mxu0 %v3661_v26 }
 0xad0   :  { %v1187_v41 = vpop.xlane.xlu1 %1186 }
 0xad1   :  { %v1191_v44 = vsub.f32 %v1179_v34, %v1187_v41 }
 0xad2   :  { %v1190_v46 = vpop.xlane.xlu0 %1189 }
 0xad3   :  { %v1193_v47 = vmul.f32 1.442695, %v1191_v44  ;;  %v1192_v49 = vsub.f32 %v1182_v37, %v1190_v46  ;;  %v3103_v37 = vld [vmem:[#allocation8 + $0x30] sm:$0xff]  }
 0xad4   :  { %v1209_v50 = vpop.permute.xlu1 %1208 }
 0xad5   :  { %3226 = vpow2.f32 %v1193_v47  ;;  %v1195_v51 = vmul.f32 1.442695, %v1192_v49  ;;  %2935 = vmatpush3.bf16.msra.mxu1 %v1209_v50 }
 0xad6   :  { %2948 = vmatprep.subr.bf16.mxu1 %v3661_v26 }
 0xad7   :  { %3228 = vpow2.f32 %v1195_v51 }
 0xadf   :  { %v3227_v55 = vpop.eup %3226 }
 0xae0   :  { %v1197_v57 = vsel %vm828_vm3, %v3227_v55, 0.0 }
 0xae1   :  { %v3229_v58 = vpop.eup %3228  ;;  %1198 = vadd.xlane.f32.xlu0 %v1197_v57 }
 0xae2   :  { %v1200_v59 = vsel %vm828_vm3, %v3229_v58, 0.0 }
 0xae5   :  { %1201 = vadd.xlane.f32.xlu0 %v1200_v59  ;;  %v3106_v59 = vld [vmem:[#allocation11 + $0x8] sm:$0xff]  }
 0xafb   :  { %1316 = vrot.lane.b32.xlu0 %v4127_v43, %s3664_s29  ;;  %v1315_v43 = vpop.permute.xlu1 %1314 }
 0xb6e   :  { %v1199_v60 = vpop.xlane.xlu0 %1198 }
 0xb6f   :  { %3230 = vrcp.f32 %v1199_v60  ;;  %v3108_v60 = vld [vmem:[#allocation11 + $0x18] sm:$0xff]  }
 0xb72   :  { %v1202_v61 = vpop.xlane.xlu0 %1201 }
 0xb73   :  { %3232 = vrcp.f32 %v1202_v61  ;;  %v3109_v61 = vld [vmem:[#allocation11 + $0x20] sm:$0xff]  }
 0xb76   :  { %v1317_v3 = vpop.permute.xlu0 %1316 }
 0xb77   :  { %v1322_v5 = vsel %vm780_vm2, %v1317_v3, 0 }
 0xb79   :  { %v3231_v62 = vpop.eup %3230 }
 0xb7a   :  { %v1205_v1 = vmul.f32 %v3231_v62, %v3227_v55  ;;  %v3110_v62 = vld [vmem:[#allocation11 + $0x28] sm:$0xff]  }
 0xb7d   :  { %v3233_v63 = vpop.eup %3232 }
 0xb7e   :  { %v1206_v2 = vmul.f32 %v3233_v63, %v3229_v58 }
 0xb80   :  { %v1207_v4 = vpack.c.bf16 %v1206_v2, %v1205_v1 }
 0xb82   :  { %2937 = vmatmul.mubr.msk.bf16.vlgmr.msra.gmra.mrb[16].mxu1 %vm828_vm3, %v1207_v4 }
 0xb83   :  { %2949 = vmatpush3.bf16.xpose.msra.mxu1 %v1322_v5  ;;  %2950 = vmatprep.mubr.msk.bf16.mxu1 %vm3662_vm1, %v3661_v26  ;;  %v3111_v5 = vld [vmem:[#allocation11 + $0x30] sm:$0xff]  }
 0xb84   :  { %2960 = vmatprep.subr.bf16.mxu1 %v3661_v26 }
 0xb8a   :  { %2951 = vmatmul.mubr.msk.bf16.vlgmr.msra.gmra.mrb[20].mxu1 %vm780_vm2, %v1315_v43  ;;  %v3112_v43 = vld [vmem:[#allocation11 + $0x38] sm:$0xff]  }
 0xb8b   :  { %2964 = vmatprep.mubr.msk.bf16.mxu1 %vm3662_vm1, %v3661_v26  ;;  %2961 = vmatpush3.bf16.msra.mxu1 %v3103_v37 }
 0xb8c   :  { %2962 = vmatprep.subr.bf16.mxu1 %v3661_v26 }
 0xc55   :  { %v1248_v7 = vpop.f32.mrb[16].mxu1 }
 0xc56   :  { %v2938_v10 = vpop.f32.mrb[17].mxu1 }
 0xc57   :  { %v1251_v11 = vpop.f32.mrb[18].mxu1 }
 0xc58   :  { %v1255_v12 = vpack.c.bf16 %v1251_v11, %v1248_v7  ;;  %v2939_v13 = vpop.f32.mrb[19].mxu1  ;;  %v2709_v7 = vld [vmem:[#allocation10] ss:$0 sm:$0xff] }
 0xc5a   :  { %2945 = vmatmul.mubr.msk.bf16.vlgmr.msra.gmra.mrb[24].mxu0 %vm780_vm2, %v1255_v12 }
 0xc5b   :  { %2956 = vmatprep.mubr.msk.bf16.mxu0 %vm3662_vm1, %v3661_v26 }
 0xc5d   :  { %v1358_v14 = vpop.f32.mrb[20].mxu1 }
 0xc5e   :  { %v1359_v15 = vadd.f32 %v1358_v14, %v4152_v54  ;;  %v2952_v16 = vpop.f32.mrb[21].mxu1 }
 0xc5f   :  { %v1361_v17 = vpop.f32.mrb[22].mxu1 }
 0xc60   :  { %v1362_v18 = vadd.f32 %v1361_v17, %v4157_v56  ;;  %v2953_v19 = vpop.f32.mrb[23].mxu1  ;;  %v1365_v20 = vsel %vm828_vm3, %v1359_v15, -inf }
 0xc61   :  { %1366 = vmax.xlane.f32.xlu1 %v1365_v20 }
 0xc62   :  { %v1368_v21 = vsel %vm828_vm3, %v1362_v18, -inf }
 0xc63   :  { %1369 = vmax.xlane.f32.xlu0 %v1368_v21 }
 0xcee   :  { %v1367_v22 = vpop.xlane.xlu1 %1366 }
 0xcef   :  { %v1371_v24 = vsub.f32 %v1359_v15, %v1367_v22 }
 0xcf0   :  { %v1370_v25 = vpop.xlane.xlu0 %1369 }
 0xcf1   :  { %v1373_v32 = vmul.f32 1.442695, %v1371_v24  ;;  %v1372_v33 = vsub.f32 %v1362_v18, %v1370_v25  ;;  %v2710_v18 = vld [vmem:[#allocation13] ss:$0 sm:$0xff] }
 0xcf3   :  { %3234 = vpow2.f32 %v1373_v32  ;;  %v1375_v34 = vmul.f32 1.442695, %v1372_v33 }
 0xcf5   :  { %3236 = vpow2.f32 %v1375_v34 }
 0xcfd   :  { %v3235_v54 = vpop.eup %3234 }
 0xcfe   :  { %v1377_v35 = vsel %vm828_vm3, %v3235_v54, 0.0 }
 0xcff   :  { %v3237_v36 = vpop.eup %3236  ;;  %1378 = vadd.xlane.f32.xlu0 %v1377_v35 }
 0xd00   :  { %v1380_v56 = vsel %vm828_vm3, %v3237_v36, 0.0 }
 0xd01   :  { %1381 = vadd.xlane.f32.xlu1 %v1380_v56 }
 0xd15   :  { %1388 = vrot.lane.b32.xlu0 %v4145_v53, %s3664_s29 }
 0xd2d   :  { %v1305_v38 = vpop.f32.mrb[24].mxu0 }
 0xd2e   :  { %v1312_v39 = vadd.f32 %v1305_v38, %v4208_v23  ;;  %v2946_v40 = vpop.f32.mrb[25].mxu0  ;;  %v3104_v23 = vld [vmem:[#allocation8 + $0x38] sm:$0xff]  }
 0xd2f   :  { %v1308_v41 = vpop.f32.mrb[26].mxu0  ;;  %2963 = vmatpush3.bf16.msra.mxu1 %v3104_v23  ;;  %v3113_v38 = vld [vmem:[%s4600_s15] sm:$0xff]   ;;  %v3115_v40 = vld [vmem:[%s4600_s15 + $0x10] sm:$0xff]  }
 0xd30   :  { %v1313_v44 = vadd.f32 %v1308_v41, %v4210_v27  ;;  %v2947_v46 = vpop.f32.mrb[27].mxu0  ;;  %2988 = vmatprep.subr.bf16.mxu1 %v3661_v26  ;;  %v3105_v27 = vld [vmem:[#allocation11] sm:$0xff]   ;;  %v3116_v41 = vld [vmem:[%s4600_s15 + $0x18] sm:$0xff]  }
 0xd31   :  { %v3118_v46 = vld [vmem:[%s4600_s15 + $0x28] sm:$0xff]  }
 0xd8c   :  { %v1379_v47 = vpop.xlane.xlu0 %1378 }
 0xd8d   :  { %3238 = vrcp.f32 %v1379_v47  ;;  %v3119_v47 = vld [vmem:[%s4600_s15 + $0x30] sm:$0xff]  }
 0xd8e   :  { %v1382_v49 = vpop.xlane.xlu1 %1381 }
 0xd8f   :  { %3240 = vrcp.f32 %v1382_v49  ;;  %v3120_v49 = vld [vmem:[%s4600_s15 + $0x38] sm:$0xff]  }
 0xd90   :  { %v1389_v50 = vpop.permute.xlu0 %1388 }
 0xd91   :  { %2955 = vmatpush3.bf16.msra.mxu0 %v1389_v50 }
 0xd92   :  { %2968 = vmatprep.subr.bf16.mxu0 %v3661_v26 }
 0xd97   :  { %v3239_v53 = vpop.eup %3238 }
 0xd98   :  { %v1385_v55 = vmul.f32 %v3239_v53, %v3235_v54 }
 0xd99   :  { %v3241_v51 = vpop.eup %3240 }
 0xd9a   :  { %v1386_v57 = vmul.f32 %v3241_v51, %v3237_v36 }
 0xd9c   :  { %v1387_v58 = vpack.c.bf16 %v1386_v57, %v1385_v55 }
 0xd9e   :  { %2957 = vmatmul.mubr.msk.bf16.vlgmr.msra.gmra.mrb[28].mxu0 %vm828_vm3, %v1387_v58 }
 0xd9f   :  { %2984 = vmatprep.mubr.msk.bf16.mxu0 %vm3662_vm1, %v3661_v26  ;;  %2969 = vmatpush3.bf16.msra.mxu0 %v3105_v27  ;;  %v2719_v27 = vld [vmem:[#allocation14] ss:$0 sm:$0xff] }
 0xda0   :  { %2970 = vmatprep.subr.bf16.mxu0 %v3661_v26 }
 0xda3   :  { %2971 = vmatpush3.bf16.msra.mxu0 %v3106_v59 }
 0xda4   :  { %2972 = vmatprep.subr.bf16.mxu0 %v3661_v26 }
 0xda7   :  { %2973 = vmatpush3.bf16.msra.mxu0 %v3107_v42  ;;  %v2720_v42 = vld [vmem:[#allocation16] ss:$0 sm:$0xff] }
 0xda8   :  { %2974 = vmatprep.subr.bf16.mxu0 %v3661_v26 }
 0xdab   :  { %2975 = vmatpush3.bf16.msra.mxu0 %v3108_v60 }
 0xdac   :  { %2976 = vmatprep.subr.bf16.mxu0 %v3661_v26 }
 0xdaf   :  { %2977 = vmatpush3.bf16.msra.mxu0 %v3109_v61 }
 0xdb0   :  { %2978 = vmatprep.subr.bf16.mxu0 %v3661_v26 }
 0xdb3   :  { %2979 = vmatpush3.bf16.msra.mxu0 %v3110_v62 }
 0xdb4   :  { %2980 = vmatprep.subr.bf16.mxu0 %v3661_v26 }
 0xdb7   :  { %2981 = vmatpush3.bf16.msra.mxu0 %v3111_v5 }
 0xdb8   :  { %2982 = vmatprep.subr.bf16.mxu0 %v3661_v26 }
 0xdbb   :  { %2983 = vmatpush3.bf16.msra.mxu0 %v3112_v43 }
 0xe71   :  { %v1428_v63 = vpop.f32.mrb[28].mxu0 }
 0xe72   :  { %v2958_v1 = vpop.f32.mrb[29].mxu0 }
 0xe73   :  { %v1431_v2 = vpop.f32.mrb[30].mxu0 }
 0xe74   :  { %v1435_v3 = vpack.c.bf16 %v1431_v2, %v1428_v63  ;;  %v2959_v4 = vpop.f32.mrb[31].mxu0 }
 0xe76   :  { %2965 = vmatmul.mubr.msk.bf16.vlgmr.msra.gmra.mrb[24].mxu1 %vm780_vm2, %v1435_v3 }
 0xe77   :  { %3004 = vmatprep.mubr.msk.bf16.mxu1 %vm3662_vm1, %v3661_v26  ;;  %2989 = vmatpush3.bf16.msra.mxu1 %v3113_v38  ;;  %v3132_v38 = vld [vmem:[%s4603_s18 + $0x2c] ss:$16 sps:$4 sm:$0xff]  }
 0xe78   :  { %2990 = vmatprep.subr.bf16.mxu1 %v3661_v26 }
 0xf49   :  { %v1485_v6 = vpop.f32.mrb[24].mxu1 }
 0xf4a   :  { %v1492_v10 = vadd.f32 %v1485_v6, %v1312_v39  ;;  %v2966_v11 = vpop.f32.mrb[25].mxu1  ;;  %v3114_v39 = vld [vmem:[%s4600_s15 + $0x8] sm:$0xff]  }
 0xf4b   :  { %v1488_v12 = vpop.f32.mrb[26].mxu1  ;;  %2991 = vmatpush3.bf16.msra.mxu1 %v3114_v39  ;;  %v3127_v39 = vld [vmem:[%s4603_s18 + $0x20] ss:$16 sps:$4 sm:$0xff]  }
 0xf4c   :  { %v1501_v13 = vadd.f32 %v2709_v7, %v1492_v10  ;;  %v1493_v14 = vadd.f32 %v1488_v12, %v1313_v44  ;;  %v2967_v15 = vpop.f32.mrb[27].mxu1  ;;  %2992 = vmatprep.subr.bf16.mxu1 %v3661_v26  ;;  %v3117_v44 = vld [vmem:[%s4600_s15 + $0x20] sm:$0xff]  }
 0xf4e   :  { %1503 = vst [vmem:[#allocation25] sm:$0xff] %v1501_v13  ;;  %v1502_v16 = vadd.f32 %v2709_v7, %v1493_v14  ;;  %v4304_v14 = vsub.s32 3, %v4111_v28 }
 0xf4f   :  { %2993 = vmatpush3.bf16.msra.mxu1 %v3115_v40  ;;  %v3130_v40 = vld [vmem:[%s4603_s18 + $0x28] ss:$16 sps:$4 sm:$0xff]  }
 0xf50   :  { %1504 = vst [vmem:[#allocation25 + $0x8] sm:$0xff] %v1502_v16  ;;  %v1505_v17 = vpack.c.bf16 %v1502_v16, %v1501_v13  ;;  %2994 = vmatprep.subr.bf16.mxu1 %v3661_v26  ;;  %v510_v15 = vrot.slane %v4116_v30, %v4304_v14 }
 0xf52   :  { %2985 = vmatmul.mubr.bf16.vlgmr.msra.gmra.mrb[32].mxu0 %v1505_v17  ;;  %v755_v16 = vadd.f32 %v4141_v48, %v510_v15 }
 0xf53   :  { %2106 = vmatprep.mubr.bf16.mxu0 %v3660_v0  ;;  %2995 = vmatpush3.bf16.msra.mxu1 %v3116_v41  ;;  %v3135_v41 = vld [vmem:[%s4603_s18 + $0x44] ss:$16 sps:$4 sm:$0xff]  }
 0xf54   :  { %2996 = vmatprep.subr.bf16.mxu1 %v3661_v26 }
 0xf57   :  { %2997 = vmatpush3.bf16.msra.mxu1 %v3117_v44  ;;  %v3138_v44 = vld [vmem:[%s4603_s18 + $0x4c] ss:$16 sps:$4 sm:$0xff]  }
 0xf58   :  { %2998 = vmatprep.subr.bf16.mxu1 %v3661_v26 }
 0xf5b   :  { %2999 = vmatpush3.bf16.msra.mxu1 %v3118_v46  ;;  %v3133_v46 = vld [vmem:[%s4603_s18 + $0x40] ss:$16 sps:$4 sm:$0xff]  }
 0xf5c   :  { %3000 = vmatprep.subr.bf16.mxu1 %v3661_v26 }
 0xf5f   :  { %3001 = vmatpush3.bf16.msra.mxu1 %v3119_v47  ;;  %v3136_v47 = vld [vmem:[%s4603_s18 + $0x48] ss:$16 sps:$4 sm:$0xff]  }
 0xf60   :  { %3002 = vmatprep.subr.bf16.mxu1 %v3661_v26 }
 0xf63   :  { %3003 = vmatpush3.bf16.msra.mxu1 %v3120_v49  ;;  %v3141_v49 = vld [vmem:[%s4603_s18 + $0x64] ss:$16 sps:$4 sm:$0xff]  }
0x1025   :  { %v1611_v19 = vpop.f32.mrb[32].mxu0 }
0x1026   :  { %v1612_v20 = vadd.f32 %v2710_v18, %v1611_v19  ;;  %v2986_v21 = vpop.f32.mrb[33].mxu0 }
0x1027   :  { %v1614_v22 = vpop.f32.mrb[34].mxu0 }
0x1028   :  { %1620 = vadd.xlane.f32.xlu1 %v1612_v20  ;;  %v2987_v24 = vpop.f32.mrb[35].mxu0  ;;  %v1615_v25 = vadd.f32 %v2710_v18, %v1614_v22  ;;  %v759_v18 = vadd.f32 %v4143_v52, %v510_v15 }
0x102c   :  { %1622 = vadd.xlane.f32.xlu1 %v1615_v25 }
0x10b5   :  { %v1621_v32 = vpop.xlane.xlu1 %1620 }
0x10b6   :  { %v1624_v33 = vmul.f32 0.0078125, %v1621_v32 }
0x10b8   :  { %v1626_v34 = vsub.f32 %v1612_v20, %v1624_v33 }
0x10b9   :  { %v1623_v54 = vpop.xlane.xlu1 %1622 }
0x10ba   :  { %v1625_v35 = vmul.f32 0.0078125, %v1623_v54  ;;  %v1628_v36 = vmul.f32 %v1626_v34, %v1626_v34  ;;  %v3123_v54 = vld [vmem:[%s4603_s18 + $0x4] ss:$16 sps:$4 sm:$0xff]  }
0x10bb   :  { %2074 = vmatprep.subr.bf16.mxu0 %v3123_v54 }
0x10bc   :  { %v1627_v56 = vsub.f32 %v1615_v25, %v1625_v35  ;;  %1630 = vadd.xlane.f32.xlu1 %v1628_v36  ;;  %v3126_v35 = vld [vmem:[%s4603_s18 + $0xc] ss:$16 sps:$4 sm:$0xff]   ;;  %v3121_v36 = vld [vmem:[%s4603_s18] ss:$16 sps:$4 sm:$0xff]  }
0x10bd   :  { %2115 = vmatprep.subr.bf16.mxu1 %v3126_v35  ;;  %2075 = vmatpush1.bf16.msra.mxu0 %v3121_v36 }
0x10be   :  { %v1629_v37 = vmul.f32 %v1627_v56, %v1627_v56 }
0x10c0   :  { %1632 = vadd.xlane.f32.xlu1 %v1629_v37  ;;  %v3129_v37 = vld [vmem:[%s4603_s18 + $0x24] ss:$16 sps:$4 sm:$0xff]  }
0x10c1   :  { %2076 = vmatprep.subr.bf16.mxu0 %v3129_v37 }
0x10c2   :  { %2077 = vmatpush1.bf16.msra.mxu0 %v3127_v39 }
0x10c3   :  { %2078 = vmatprep.subr.bf16.mxu0 %v3135_v41 }
0x10c6   :  { %2079 = vmatpush1.bf16.msra.mxu0 %v3133_v46 }
0x10c7   :  { %2080 = vmatprep.subr.bf16.mxu0 %v3141_v49 }
0x1149   :  { %v1631_v50 = vpop.xlane.xlu1 %1630 }
0x114a   :  { %v1634_v53 = vmul.f32 0.0078125, %v1631_v50  ;;  %v3144_v50 = vld [vmem:[%s4603_s18 + $0x6c] ss:$16 sps:$4 sm:$0xff]  }
0x114c   :  { %v1636_v51 = vadd.f32 1e-05, %v1634_v53  ;;  %v3139_v53 = vld [vmem:[%s4603_s18 + $0x60] ss:$16 sps:$4 sm:$0xff]  }
0x114d   :  { %v1633_v55 = vpop.xlane.xlu1 %1632  ;;  %2081 = vmatpush1.bf16.msra.mxu0 %v3139_v53 }
0x114e   :  { %3242 = vrsqrt.f32 %v1636_v51  ;;  %v1635_v57 = vmul.f32 0.0078125, %v1633_v55  ;;  %v3142_v51 = vld [vmem:[%s4603_s18 + $0x68] ss:$16 sps:$4 sm:$0xff]   ;;  %v3147_v55 = vld [vmem:[%s4603_s18 + $0x84] ss:$16 sps:$4 sm:$0xff]  }
0x114f   :  { %2082 = vmatprep.subr.bf16.mxu0 %v3147_v55 }
0x1150   :  { %v1637_v58 = vadd.f32 1e-05, %v1635_v57  ;;  %v3150_v57 = vld [vmem:[%s4603_s18 + $0x8c] ss:$16 sps:$4 sm:$0xff]  }
0x1152   :  { %3244 = vrsqrt.f32 %v1637_v58  ;;  %v3145_v58 = vld [vmem:[%s4603_s18 + $0x80] ss:$16 sps:$4 sm:$0xff]  }
0x1153   :  { %2083 = vmatpush1.bf16.msra.mxu0 %v3145_v58 }
0x1158   :  { %v3243_v23 = vpop.eup %3242 }
0x1159   :  { %v1640_v59 = vmul.f32 %v3243_v23, %v1626_v34  ;;  %v3148_v23 = vld [vmem:[%s4603_s18 + $0x88] ss:$16 sps:$4 sm:$0xff]  }
0x115b   :  { %v1648_v60 = vmul.f32 %v2719_v27, %v1640_v59  ;;  %v3156_v59 = vld [vmem:[%s4603_s18 + $0xac] ss:$16 sps:$4 sm:$0xff]  }
0x115c   :  { %v3245_v61 = vpop.eup %3244 }
0x115d   :  { %v1641_v62 = vmul.f32 %v3245_v61, %v1627_v56  ;;  %v1656_v63 = vadd.f32 %v2720_v42, %v1648_v60  ;;  %v3124_v56 = vld [vmem:[%s4603_s18 + $0x8] ss:$16 sps:$4 sm:$0xff]   ;;  %v3159_v61 = vld [vmem:[%s4603_s18 + $0xc4] ss:$16 sps:$4 sm:$0xff]  }
0x115e   :  { %v3154_v60 = vld [vmem:[%s4603_s18 + $0xa8] ss:$16 sps:$4 sm:$0xff]  }
0x115f   :  { %v1649_v1 = vmul.f32 %v2719_v27, %v1641_v62  ;;  %v1660_v2 = vmul.f32 0.70710677, %v1656_v63  ;;  %v1658_v6 = vmul.f32 0.5, %v1656_v63  ;;  %v3153_v27 = vld [vmem:[%s4603_s18 + $0xa4] ss:$16 sps:$4 sm:$0xff]  }
0x1160   :  { %2084 = vmatprep.subr.bf16.mxu0 %v3153_v27  ;;  %v3162_v62 = vld [vmem:[%s4603_s18 + $0xcc] ss:$16 sps:$4 sm:$0xff]   ;;  %v3157_v63 = vld [vmem:[%s4603_s18 + $0xc0] ss:$16 sps:$4 sm:$0xff]  }
0x1161   :  { %v1657_v26 = vadd.f32 %v2720_v42, %v1649_v1  ;;  %3246 = verf.f32 %v1660_v2  ;;  %v3151_v42 = vld [vmem:[%s4603_s18 + $0xa0] ss:$16 sps:$4 sm:$0xff]   ;;  %v3160_v1 = vld [vmem:[%s4603_s18 + $0xc8] ss:$16 sps:$4 sm:$0xff]   ;;  %v3165_v2 = vld [vmem:[%s4603_s18 + $0xe4] ss:$16 sps:$4 sm:$0xff]  }
0x1162   :  { %2085 = vmatpush1.bf16.msra.mxu0 %v3151_v42 }
0x1163   :  { %v1661_v3 = vmul.f32 0.70710677, %v1657_v26  ;;  %v1659_v7 = vmul.f32 0.5, %v1657_v26  ;;  %2086 = vmatprep.subr.bf16.mxu0 %v3159_v61  ;;  %v3168_v26 = vld [vmem:[%s4603_s18 + $0xec] ss:$16 sps:$4 sm:$0xff]  }
0x1165   :  { %3248 = verf.f32 %v1661_v3  ;;  %v3163_v3 = vld [vmem:[%s4603_s18 + $0xe0] ss:$16 sps:$4 sm:$0xff]  }
0x1166   :  { %2087 = vmatpush1.bf16.msra.mxu0 %v3157_v63  ;;  %v1891_v63 = vld [vmem:[%s4638_s7] sm:$0xff] }
0x1167   :  { %2088 = vmatprep.subr.bf16.mxu0 %v3165_v2  ;;  %v2053_v2 = vcombine.high %v1891_v63, %v1891_v63 }
0x116a   :  { %2089 = vmatpush1.bf16.msra.mxu0 %v3163_v3 }
0x116b   :  { %v3247_v4 = vpop.eup %3246 }
0x116c   :  { %v1664_v5 = vadd.f32 1.0, %v3247_v4  ;;  %v3166_v4 = vld [vmem:[%s4603_s18 + $0xe8] ss:$16 sps:$4 sm:$0xff]  }
0x116e   :  { %v4296_v11 = vmul.f32 %v1664_v5, %v1658_v6 }
0x116f   :  { %v3249_v43 = vpop.eup %3248 }
0x1170   :  { %v1665_v10 = vadd.f32 1.0, %v3249_v43 }
0x1172   :  { %v4298_v12 = vmul.f32 %v1665_v10, %v1659_v7 }
0x1174   :  { %v1668_v13 = vpack.c.bf16 %v4298_v12, %v4296_v11 }
0x1176   :  { %3005 = vmatmul.mubr.bf16.vlgmr.msra.gmra.mrb[28].mxu1 %v1668_v13 }
0x1177   :  { %2147 = vmatprep.mubr.bf16.mxu1 %v3660_v0  ;;  %2116 = vmatpush1.bf16.msra.mxu1 %v3124_v56 }
0x1178   :  { %2117 = vmatprep.subr.bf16.mxu1 %v3132_v38 }
0x117b   :  { %2118 = vmatpush1.bf16.msra.mxu1 %v3130_v40 }
0x117c   :  { %2119 = vmatprep.subr.bf16.mxu1 %v3138_v44 }
0x117f   :  { %2120 = vmatpush1.bf16.msra.mxu1 %v3136_v47 }
0x1180   :  { %2121 = vmatprep.subr.bf16.mxu1 %v3144_v50 }
0x1183   :  { %2122 = vmatpush1.bf16.msra.mxu1 %v3142_v51 }
0x1184   :  { %2123 = vmatprep.subr.bf16.mxu1 %v3150_v57 }
0x1187   :  { %2124 = vmatpush1.bf16.msra.mxu1 %v3148_v23 }
0x1188   :  { %2125 = vmatprep.subr.bf16.mxu1 %v3156_v59 }
0x118b   :  { %2126 = vmatpush1.bf16.msra.mxu1 %v3154_v60  ;;  %v3665_v60 = vmov 1983009808  }
0x118c   :  { %2127 = vmatprep.subr.bf16.mxu1 %v3162_v62  ;;  %v2055_v61 = vunpack.c.l.s4 %v3665_v60  ;;  %v3180_v60 = vld [vmem:[%s4606_s21 + $0x10] sm:$0xff]  }
0x118e   :  { %v2056_v62 = vunpack.c.0.s8 %v2055_v61  ;;  %v3181_v61 = vld [vmem:[%s4606_s21 + $0x90] sm:$0xff]  }
0x118f   :  { %2128 = vmatpush1.bf16.msra.mxu1 %v3160_v1 }
0x1190   :  { %2129 = vmatprep.subr.bf16.mxu1 %v3168_v26  ;;  %v2059_v1 = vsub.s32 %v2056_v62, %v4111_v28  ;;  %v3182_v62 = vld [vmem:[%s4606_s21 + $0x58] sm:$0xff]  }
0x1192   :  { %v2060_v26 = vrot.slane %v1891_v63, %v2059_v1  ;;  %v2067_v3 = vrot.slane %v2053_v2, %v2059_v1  ;;  %v3183_v63 = vld [vmem:[%s4606_s21 + $0xd8] sm:$0xff]  }
0x1193   :  { %2130 = vmatpush1.bf16.msra.mxu1 %v3166_v4  ;;  %v3184_v1 = vld [vmem:[%s4606_s21 + $0x18] sm:$0xff]  }
0x1194   :  { %v2068_v4 = vcombine.high %v2060_v26, %v2060_v26  ;;  %v3185_v2 = vld [vmem:[%s4606_s21 + $0x98] sm:$0xff]  }
0x1249   :  { %v1767_v17 = vpop.f32.mrb[28].mxu1 }
0x124a   :  { %v1774_v19 = vadd.f32 %v1767_v17, %v755_v16  ;;  %v3006_v20 = vpop.f32.mrb[29].mxu1  ;;  %v2729_v16 = vld [vmem:[#allocation17] ss:$0 sm:$0xff] }
0x124b   :  { %v1770_v21 = vpop.f32.mrb[30].mxu1 }
0x124c   :  { %v1775_v22 = vadd.f32 %v1770_v21, %v759_v18  ;;  %v3007_v24 = vpop.f32.mrb[31].mxu1  ;;  %v2730_v18 = vld [vmem:[#allocation19] ss:$0 sm:$0xff] }
0x124e   :  { %1780 = vadd.xlane.f32.xlu1 %v1775_v22 }
0x1252   :  { %1778 = vadd.xlane.f32.xlu1 %v1774_v19 }
0x12db   :  { %v1781_v25 = vpop.xlane.xlu1 %1780 }
0x12dc   :  { %v1783_v0 = vmul.f32 0.0078125, %v1781_v25 }
0x12de   :  { %v4310_v32 = vsub.f32 %v1775_v22, %v1783_v0 }
0x12df   :  { %v1779_v33 = vpop.xlane.xlu1 %1778 }
0x12e0   :  { %v1782_v34 = vmul.f32 0.0078125, %v1779_v33  ;;  %v1787_v30 = vmul.f32 %v4310_v32, %v4310_v32 }
0x12e2   :  { %v4314_v48 = vsub.f32 %v1774_v19, %v1782_v34  ;;  %1790 = vadd.xlane.f32.xlu0 %v1787_v30 }
0x12e4   :  { %v1786_v52 = vmul.f32 %v4314_v48, %v4314_v48 }
0x12e6   :  { %1788 = vadd.xlane.f32.xlu1 %v1786_v52 }
0x136f   :  { %v1791_v5 = vpop.xlane.xlu0 %1790 }
0x1370   :  { %v1793_v43 = vmul.f32 0.0078125, %v1791_v5  ;;  %v2069_v5 = vcombine.high %v2067_v3, %v2067_v3 }
0x1372   :  { %v1795_v6 = vadd.f32 1e-05, %v1793_v43 }
0x1373   :  { %v1789_v7 = vpop.xlane.xlu1 %1788 }
0x1374   :  { %3250 = vrsqrt.f32 %v1795_v6  ;;  %v1792_v10 = vmul.f32 0.0078125, %v1789_v7 }
0x1376   :  { %v1794_v13 = vadd.f32 1e-05, %v1792_v10 }
0x1378   :  { %3252 = vrsqrt.f32 %v1794_v13 }
0x137e   :  { %v3251_v15 = vpop.eup %3250 }
0x137f   :  { %v1799_v17 = vmul.f32 %v3251_v15, %v4310_v32 }
0x1381   :  { %v1807_v19 = vmul.f32 %v2729_v16, %v1799_v17 }
0x1382   :  { %v3253_v20 = vpop.eup %3252 }
0x1383   :  { %v1815_v21 = vadd.f32 %v2730_v18, %v1807_v19  ;;  %v1798_v22 = vmul.f32 %v3253_v20, %v4314_v48 }
0x1385   :  { %v2732_v24 = vmul.f32 -1.442695, %v1815_v21  ;;  %v1806_v25 = vmul.f32 %v2729_v16, %v1798_v22 }
0x1387   :  { %3254 = vpow2.f32 %v2732_v24  ;;  %v1814_v0 = vadd.f32 %v2730_v18, %v1806_v25 }
0x1389   :  { %v2731_v33 = vmul.f32 -1.442695, %v1814_v0 }
0x138b   :  { %3256 = vpow2.f32 %v2731_v33 }
0x1391   :  { %v3255_v34 = vpop.eup %3254 }
0x1392   :  { %v1823_v30 = vadd.f32 1.0, %v3255_v34 }
0x1394   :  { %3258 = vrcp.f32 %v1823_v30 }
0x1395   :  { %v3257_v52 = vpop.eup %3256 }
0x1396   :  { %v1822_v54 = vadd.f32 1.0, %v3257_v52 }
0x1398   :  { %3260 = vrcp.f32 %v1822_v54 }
0x139e   :  { %v3259_v35 = vpop.eup %3258 }
0x139f   :  { %v1849_v32 = vsub.f32 1.0, %v3259_v35  ;;  %v1836_v36 = vrot.slane %v3259_v35, 4  ;;  %v1847_v56 = vmul.f32 %v3259_v35, %v4055_v9 }
0x13a1   :  { %v1851_v37 = vmul.f32 %v1849_v32, %v4298_v12  ;;  %v1837_v48 = vadd.f32 %v3259_v35, %v1836_v36  ;;  %v3170_v32 = vld [vmem:[%s4606_s21 + $0x40] sm:$0xff]  }
0x13a2   :  { %v3261_v38 = vpop.eup %3260  ;;  %v3171_v36 = vld [vmem:[%s4606_s21 + $0xc0] sm:$0xff]   ;;  %2844 = vmatprep.subr.bf16.mxu0 %v3170_v32 }
0x13a3   :  { %v1848_v39 = vsub.f32 1.0, %v3261_v38  ;;  %v1853_v40 = vadd.f32 %v1851_v37, %v1847_v56  ;;  %v1828_v41 = vrot.slane %v3261_v38, 4  ;;  %v1838_v44 = vrot.slane %v1837_v48, 2  ;;  %v3172_v56 = vld [vmem:[%s4606_s21] sm:$0xff]   ;;  %2866 = vmatprep.subr.bf16.mxu1 %v3171_v36 }
0x13a4   :  { %v1846_v46 = vmul.f32 %v3261_v38, %v4053_v8  ;;  %v3173_v37 = vld [vmem:[%s4606_s21 + $0x80] sm:$0xff]  }
0x13a5   :  { %v1850_v47 = vmul.f32 %v1848_v39, %v4296_v11  ;;  %v1829_v49 = vadd.f32 %v3261_v38, %v1828_v41  ;;  %v1839_v50 = vadd.f32 %v1838_v44, %v1837_v48  ;;  %v1855_v51 = vrot.slane %v1853_v40, 7  ;;  %v3174_v48 = vld [vmem:[%s4606_s21 + $0x48] sm:$0xff]  }
0x13a6   :  { %v3175_v38 = vld [vmem:[%s4606_s21 + $0xc8] sm:$0xff]  }
0x13a7   :  { %v1852_v53 = vadd.f32 %v1850_v47, %v1846_v46  ;;  %v1830_v55 = vrot.slane %v1829_v49, 2  ;;  %v1840_v57 = vrot.slane %v1839_v50, 1  ;;  %v3176_v39 = vld [vmem:[%s4606_s21 + $0x8] sm:$0xff]  }
0x13a8   :  { %v3177_v40 = vld [vmem:[%s4606_s21 + $0x88] sm:$0xff]  }
0x13a9   :  { %v1857_v9 = vsel %vm1843_vm4, %v1852_v53, %v1855_v51  ;;  %v1831_v12 = vadd.f32 %v1830_v55, %v1829_v49  ;;  %v1841_v27 = vadd.f32 %v1840_v57, %v1839_v50 }
0x13aa   :  { %v1858_v58 = vpack.c.bf16 %v1857_v9, %v1857_v9 }
0x13ab   :  { %v1832_v23 = vrot.slane %v1831_v12, 1  ;;  %v1842_v8 = vmul.f32 0.125, %v1841_v27 }
0x13ac   :  { %2107 = vmatmul.mubr.bf16.vlgmr.msra.gmra.mrb[36].mxu0 %v1858_v58  ;;  %2148 = vmatmul.mubr.bf16.vlgmr.msra.gmra.mrb[32].mxu1 %v1858_v58 }
0x13ad   :  { %v1833_v59 = vadd.f32 %v1832_v23, %v1831_v12  ;;  %2845 = vmatpush3.bf16.msra.mxu0 %v3172_v56  ;;  %2867 = vmatpush3.bf16.msra.mxu1 %v3173_v37 }
0x13ae   :  { %2846 = vmatprep.subr.bf16.mxu0 %v3174_v48  ;;  %2868 = vmatprep.subr.bf16.mxu1 %v3175_v38 }
0x13af   :  { %v1835_v42 = vmul.f32 0.125, %v1833_v59 }
0x13b1   :  { %v1844_v11 = vsel %vm1843_vm4, %v1835_v42, %v1842_v8  ;;  %2847 = vmatpush3.bf16.msra.mxu0 %v3176_v39  ;;  %2869 = vmatpush3.bf16.msra.mxu1 %v3177_v40  ;;  %v3178_v8 = vld [vmem:[%s4606_s21 + $0x50] sm:$0xff]  }
0x13b2   :  { %1845 = vst [vmem:[#allocation26] sm:$0x3] %v1844_v11  ;;  %v3179_v11 = vld [vmem:[%s4606_s21 + $0xd0] sm:$0xff]   ;;  %2848 = vmatprep.subr.bf16.mxu0 %v3178_v8 }
0x13b3   :  { %2870 = vmatprep.subr.bf16.mxu1 %v3179_v11 }
0x13b5   :  { %2849 = vmatpush3.bf16.msra.mxu0 %v3180_v60  ;;  %2871 = vmatpush3.bf16.msra.mxu1 %v3181_v61 }
0x13b6   :  { %2850 = vmatprep.subr.bf16.mxu0 %v3182_v62  ;;  %2872 = vmatprep.subr.bf16.mxu1 %v3183_v63 }
0x13b9   :  { %2851 = vmatpush3.bf16.msra.mxu0 %v3184_v1  ;;  %2873 = vmatpush3.bf16.msra.mxu1 %v3185_v2 }
0x147f   :  { %v2108_v43 = vpop.f32.mrb[36].mxu0  ;;  %v2149_v6 = vpop.f32.mrb[32].mxu1 }
0x1480   :  { %v2109_v7 = vadd.f32 %v2108_v43, %v2060_v26  ;;  %v2150_v10 = vadd.f32 %v2149_v6, %v2067_v3  ;;  %v2110_v13 = vpop.f32.mrb[37].mxu0  ;;  %v2151_v15 = vpop.f32.mrb[33].mxu1  ;;  %v3186_v26 = vld [vmem:[%s4606_s21 + $0x60] sm:$0xff]   ;;  %v3190_v43 = vld [vmem:[%s4606_s21 + $0x68] sm:$0xff]  }
0x1481   :  { %v2111_v16 = vadd.f32 %v2110_v13, %v2068_v4  ;;  %v2112_v17 = vpop.f32.mrb[38].mxu0  ;;  %v2153_v18 = vpop.f32.mrb[34].mxu1  ;;  %v2152_v19 = vadd.f32 %v2151_v15, %v2069_v5  ;;  %v3187_v3 = vld [vmem:[%s4606_s21 + $0xe0] sm:$0xff]   ;;  %2852 = vmatprep.subr.bf16.mxu0 %v3186_v26  ;;  %v3191_v6 = vld [vmem:[%s4606_s21 + $0xe8] sm:$0xff]   ;;  %v3194_v13 = vld [vmem:[%s4606_s21 + $0x70] sm:$0xff]  }
0x1482   :  { %3262 = vtanh.f32 %v2109_v7  ;;  %v2113_v20 = vpop.f32.mrb[39].mxu0  ;;  %v2154_v21 = vpop.f32.mrb[35].mxu1  ;;  %v3188_v4 = vld [vmem:[%s4606_s21 + $0x20] sm:$0xff]   ;;  %2874 = vmatprep.subr.bf16.mxu1 %v3187_v3  ;;  %v3192_v7 = vld [vmem:[%s4606_s21 + $0x28] sm:$0xff]   ;;  %v3195_v15 = vld [vmem:[%s4606_s21 + $0xf0] sm:$0xff]  }
0x1483   :  { %3264 = vtanh.f32 %v2150_v10  ;;  %v3189_v5 = vld [vmem:[%s4606_s21 + $0xa0] sm:$0xff]   ;;  %2853 = vmatpush3.bf16.msra.mxu0 %v3188_v4  ;;  %v3193_v10 = vld [vmem:[%s4606_s21 + $0xa8] sm:$0xff]   ;;  %v3197_v17 = vld [vmem:[%s4606_s21 + $0xb0] sm:$0xff]  }
0x1484   :  { %3266 = vtanh.f32 %v2111_v16  ;;  %2875 = vmatpush3.bf16.msra.mxu1 %v3189_v5  ;;  %2854 = vmatprep.subr.bf16.mxu0 %v3190_v43  ;;  %v3196_v16 = vld [vmem:[%s4606_s21 + $0x30] sm:$0xff]   ;;  %v3198_v18 = vld [vmem:[%s4606_s21 + $0x78] sm:$0xff]  }
0x1485   :  { %3268 = vtanh.f32 %v2152_v19  ;;  %2876 = vmatprep.subr.bf16.mxu1 %v3191_v6  ;;  %v3199_v19 = vld [vmem:[%s4606_s21 + $0xf8] sm:$0xff]  }
0x1486   :  { %v3200_v20 = vld [vmem:[%s4606_s21 + $0x38] sm:$0xff]  }
0x1487   :  { %2855 = vmatpush3.bf16.msra.mxu0 %v3192_v7  ;;  %v3201_v21 = vld [vmem:[%s4606_s21 + $0xb8] sm:$0xff]   ;;  %s3666_s21 = smov [#allocation25]  }
0x1488   :  { %2877 = vmatpush3.bf16.msra.mxu1 %v3193_v10  ;;  %2856 = vmatprep.subr.bf16.mxu0 %v3194_v13  ;;  %s2604_s0 = sshll.u32 %s3666_s21, 4  ;;  %s2605_s0 = int_to_ptr.vmem [resolvable:$true] %s2604_s0 }
0x1489   :  { %2878 = vmatprep.subr.bf16.mxu1 %v3195_v15  ;;  %s3580_s5 = scalar_lea.vmem %s2605_s0, 256  ;;  %p3585_p1 = scmp.lt.s32.totalorder %s2605_s0, %s2605_s0 }
0x148a   :  { %p3581_p0 = scmp.ne.s32.totalorder %s2605_s0, %s3580_s5  ;;  %p3586_p2 = scmp.lt.s32.totalorder %s3580_s5, %s3580_s5 }
0x148b   :  { %2857 = vmatpush3.bf16.msra.mxu0 %v3196_v16 }
0x148c   :  { %v3263_v28 = vpop.eup %3262  ;;  %2879 = vmatpush3.bf16.msra.mxu1 %v3197_v17  ;;  %2858 = vmatprep.subr.bf16.mxu0 %v3198_v18  ;;  %p3587_p3 = por %p3586_p2, %p3585_p1 }
0x148d   :  { %v3265_v22 = vpop.eup %3264  ;;  %v2163_v24 = vsel %vm2162_vm5, %v3263_v28, 0.0  ;;  %2880 = vmatprep.subr.bf16.mxu1 %v3199_v19 }
0x148e   :  { %v3267_v25 = vpop.eup %3266  ;;  %v2166_v30 = vsel %vm2162_vm5, %v3265_v22, 0.0  ;;  %p3588_p4 = pnand %p3587_p3, %p3581_p0 }
0x148f   :  { %v2164_v0 = vsel %vm2162_vm5, %v3267_v25, 0.0  ;;  %v3269_v33 = vpop.eup %3268  ;;  %2859 = vmatpush3.bf16.msra.mxu0 %v3200_v20 }
0x1490   :  { %v2165_v34 = vadd.f32 %v2164_v0, %v2163_v24  ;;  %v2168_v54 = vsel %vm2162_vm5, %v3269_v33, 0.0  ;;  %2881 = vmatpush3.bf16.msra.mxu1 %v3201_v21  ;;  %v2161_v0 = vld [vmem:[#allocation22] sm:$0xf] }
0x1491   :  { %v2239_v32 = vrot.slane %v2161_v0, %v4304_v14  ;;  %v2227_v36 = vrot.slane %v2161_v0, %v4114_v29  ;;  %v2235_v56 = vrot.slane %v2161_v0, %v4137_v45 }
0x1492   :  { %v2167_v52 = vadd.f32 %v2166_v30, %v2165_v34 }
0x1494   :  { %v2169_v35 = vadd.f32 %v2168_v54, %v2167_v52 }
0x1496   :  { %2170 = vadd.xlane.f32.xlu1 %v2169_v35  ;;  %v2231_v35 = vrot.slane %v2161_v0, %v4119_v31 }
0x1523   :  { %v2171_v41 = vpop.xlane.xlu1 %2170 }
0x1524   :  { %v2173_v44 = vmul.f32 0.001953125, %v2171_v41 }
0x1526   :  { %v4454_v46 = vsub.f32 %v3263_v28, %v2173_v44  ;;  %v4456_v47 = vsub.f32 %v3267_v25, %v2173_v44  ;;  %v4458_v49 = vsub.f32 %v3265_v22, %v2173_v44  ;;  %v4460_v50 = vsub.f32 %v3269_v33, %v2173_v44  ;;  %v2160_v25 = vld [vmem:[#allocation20] sm:$0xf] }
0x1527   :  { %v2202_v33 = vrot.slane %v2160_v25, %v4114_v29  ;;  %v2210_v34 = vrot.slane %v2160_v25, %v4137_v45  ;;  %v2206_v30 = vrot.slane %v2160_v25, %v4119_v31  ;;  %v2214_v52 = vrot.slane %v2160_v25, %v4304_v14 }
0x1528   :  { %v2178_v53 = vmul.f32 %v4454_v46, %v4454_v46  ;;  %v2179_v51 = vmul.f32 %v4456_v47, %v4456_v47  ;;  %v2180_v55 = vmul.f32 %v4458_v49, %v4458_v49  ;;  %v2181_v57 = vmul.f32 %v4460_v50, %v4460_v50 }
0x152a   :  { %v2182_v9 = vsel %vm2162_vm5, %v2178_v53, 0.0  ;;  %v2183_v12 = vsel %vm2162_vm5, %v2179_v51, 0.0  ;;  %v2185_v23 = vsel %vm2162_vm5, %v2180_v55, 0.0  ;;  %v2187_v59 = vsel %vm2162_vm5, %v2181_v57, 0.0 }
0x152b   :  { %v2184_v58 = vadd.f32 %v2183_v12, %v2182_v9 }
0x152d   :  { %v2186_v27 = vadd.f32 %v2185_v23, %v2184_v58 }
0x152f   :  { %v2188_v42 = vadd.f32 %v2187_v59, %v2186_v27 }
0x1531   :  { %2189 = vadd.xlane.f32.xlu1 %v2188_v42 }
0x15be   :  { %v2190_v28 = vpop.xlane.xlu1 %2189 }
0x15bf   :  { %v2191_v22 = vmul.f32 0.001953125, %v2190_v28 }
0x15c1   :  { %v2192_v24 = vadd.f32 1e-05, %v2191_v22 }
0x15c3   :  { %3270 = vrsqrt.f32 %v2192_v24 }
0x15cd   :  { %v3271_v54 = vpop.eup %3270 }
0x15ce   :  { %v2195_v37 = vmul.f32 %v3271_v54, %v4456_v47  ;;  %v2197_v48 = vmul.f32 %v3271_v54, %v4460_v50  ;;  %v2194_v38 = vmul.f32 %v3271_v54, %v4454_v46  ;;  %v2196_v39 = vmul.f32 %v3271_v54, %v4458_v49 }
0x15d0   :  { %v2220_v40 = vmul.f32 %v2206_v30, %v2195_v37  ;;  %v2222_v41 = vmul.f32 %v2214_v52, %v2197_v48  ;;  %v2219_v44 = vmul.f32 %v2202_v33, %v2194_v38  ;;  %v2221_v53 = vmul.f32 %v2210_v34, %v2196_v39 }
0x15d2   :  { %v2245_v51 = vadd.f32 %v2231_v35, %v2220_v40  ;;  %v2247_v31 = vadd.f32 %v2239_v32, %v2222_v41  ;;  %v2244_v55 = vadd.f32 %v2227_v36, %v2219_v44  ;;  %v2246_v14 = vadd.f32 %v2235_v56, %v2221_v53 }
0x15d4   :  { %v2249_v57 = vpack.c.bf16 %v2245_v51, %v2245_v51  ;;  %v2251_v29 = vpack.c.bf16 %v2247_v31, %v2247_v31  ;;  %v2248_v9 = vpack.c.bf16 %v2244_v55, %v2244_v55  ;;  %v2250_v45 = vpack.c.bf16 %v2246_v14, %v2246_v14 }
0x15d6   :  { %2547 = vmatprep.mubr.bf16.mxu0 %v2249_v57  ;;  %2587 = vmatprep.mubr.bf16.mxu1 %v2251_v29 }
0x15d7   :  { %2548 = vmatmul.mubr.bf16.vlgmr.msra.gmra.mrb[40].mxu0 %v2248_v9  ;;  %2588 = vmatmul.mubr.bf16.vlgmr.msra.gmra.mrb[36].mxu1 %v2250_v45 }
0x15d8   :  { %3591 = shalt.err (!%p3588_p4)
}
0x15d9   :  { %s3592_s13 = scalar_lea.hbm %s4609_s24, 256 }
0x15da   :  { %p3593_p5 = scmp.ne.s32.totalorder %s4609_s24, %s3592_s13  ;;  %p3596_p6 = scmp.lt.u32.totalorder %s3592_s13, %s4609_s24 }
0x15dc   :  { %p3598_p7 = pnand %p3596_p6, %p3593_p5 }
0x15de   :  { %3601 = shalt.err (!%p3598_p7)
}
0x15df   :  { %s3668_s17 = smov 128   ;;  %s3669_s11 = smov 8  }
0x15e0   :  { %2610 = dma.vmem_to_hbm [thread:$0]  %s2605_s0, 256, %s4609_s24, [#allocation4], %s3668_s17, %s3668_s17, %s3669_s11  }
0x15e1   :  { %s3602_s1 = scalar_lea.vmem %s2618_s14, 32  ;;  %p3607_p9 = scmp.lt.s32.totalorder %s2618_s14, %s2618_s14 }
0x15e2   :  { %p3603_p8 = scmp.ne.s32.totalorder %s2618_s14, %s3602_s1  ;;  %p3608_p10 = scmp.lt.s32.totalorder %s3602_s1, %s3602_s1 }
0x15e4   :  { %p3609_p11 = por %p3608_p10, %p3607_p9 }
0x15e6   :  { %p3610_p12 = pnand %p3609_p11, %p3603_p8 }
0x15e8   :  { %3613 = shalt.err (!%p3610_p12)
}
0x15e9   :  { %s3614_s29 = scalar_lea.hbm %s4610_s25, 32 }
0x15ea   :  { %p3615_p13 = scmp.ne.s32.totalorder %s4610_s25, %s3614_s29  ;;  %p3618_p0 = scmp.lt.u32.totalorder %s3614_s29, %s4610_s25 }
0x15ec   :  { %p3620_p1 = pnand %p3618_p0, %p3615_p13 }
0x15ee   :  { %3623 = shalt.err (!%p3620_p1)
}
0x15ef   :  { %2620 = dma.vmem_to_hbm [thread:$0]  %s2618_s14, 32, %s4610_s25, [#allocation27]   ;;  %v2765_v49 = vld [vmem:[#allocation23] ss:$0 sm:$0xff]  ;;  %vm2595_vm6 = vcmask 41984  }
0x15f0   :  { %s4639_s26 = sld [smem:[#allocation48_spill]] }
0x16aa   :  { %v2860_v46 = vpop.f32.mrb[40].mxu0  ;;  %v2882_v47 = vpop.f32.mrb[36].mxu1 }
0x16ab   :  { %v2861_v50 = vpop.f32.mrb[41].mxu0  ;;  %v2883_v12 = vpop.f32.mrb[37].mxu1 }
0x16ac   :  { %v2862_v58 = vadd.f32 %v2861_v50, %v2860_v46  ;;  %v2884_v23 = vadd.f32 %v2883_v12, %v2882_v47  ;;  %v2863_v27 = vpop.f32.mrb[42].mxu0  ;;  %v2885_v59 = vpop.f32.mrb[38].mxu1 }
0x16ad   :  { %v2864_v42 = vpop.f32.mrb[43].mxu0  ;;  %v2886_v8 = vpop.f32.mrb[39].mxu1 }
0x16ae   :  { %v2550_v11 = vadd.f32 %v2862_v58, %v2765_v49 }
0x16b0   :  { %v2590_v60 = vadd.f32 %v2884_v23, %v2550_v11 }
0x16b2   :  { %2596 = vst.msk [vmem:[%s4639_s26] sm:$0x3] %vm2595_vm6, %v2590_v60 }
0x16b3   :  { %3640 = dma.done.wait [#allocation4], 256  }
0x16b4   :  { %3641 = vsyncadd [#allocation4], 4294967040 }
0x16b5   :  { %3642 = dma.done.wait [#allocation27], 32  }
0x16b6   :  { %3643 = vsyncadd [#allocation27], 4294967264 }
0x16b7   :  { %2629 = vsyncpa [#allocation3], 1 }
0x16b8   :  { %2630 = vsyncpa [#allocation6], 1 }
0x16b9   :  { %2631 = vsyncpa [#allocation9], 1 }
0x16ba   :  { %2632 = vsyncpa [#allocation12], 1 }
0x16bb   :  { %2633 = vsyncpa [#allocation15], 1 }
0x16bc   :  { %2634 = vsyncpa [#allocation18], 1 }
0x16bd   :  { %2635 = vsyncpa [#allocation21], 1 }
0x16be   :  { %2636 = vsyncpa [#allocation24], 1 }
0x16bf   :  { %2637 = vsyncpa [#allocation4], 1 }
0x16c0   :  { %2638 = vsyncpa [#allocation27], 1 }

</bundles_post_ra>
